<compile_context>
chip_gen: v6e
topology: v6e:2x2x1
jax: 0.10.0
libtpu: 0.0.40
codegen_flags: <defaults>
</compile_context>

<pallas_src>
import jax
import jax.numpy as jnp
from jax.experimental import pallas as pl
from jax.experimental.pallas import tpu as pltpu


# ---------------------------------------------------------------------------
# Kernel
# ---------------------------------------------------------------------------
def crim_kernel(candT_ref, bembT_ref, mats_ref, w_ref, b_ref, out_ref):
    """Fused N-way projection + cosine similarity + prob_layer.

    candT_ref: (D, TB)   f32/bf16  pooled candidate vectors, batch in lanes
    bembT_ref: (D, TB)   bf16/f32  pooled context vectors, batch in lanes
    mats_ref:  (N*D, D)  bf16/f32  stacked matrices, A[n*D + i, j] = M[n, i, j]
    w_ref:     (1, N)    f32       prob_layer weight (SMEM)
    b_ref:     (1, 1)    f32       prob_layer bias   (SMEM)
    out_ref:   (1, TB)   f32       logits, lane-dense row
    """
    eps = 1e-8

    candT = candT_ref[...].astype(jnp.float32)                 # (D, TB)
    D = candT.shape[0]
    N = mats_ref.shape[0] // D

    # All N projections in one MXU matmul (f32 accumulate):
    #   projT[n*D + i, b] = sum_j M[n, i, j] * bemb[b, j]
    projT = jnp.dot(mats_ref[...], bembT_ref[...],
                    preferred_element_type=jnp.float32)         # (N*D, TB)

    cand_sq = jnp.sum(candT * candT, axis=0, keepdims=True)     # (1, TB)

    acc = jnp.zeros((1, candT.shape[1]), jnp.float32)
    # Cosine similarity + the N -> 1 prob_layer; N is small, so static unroll
    # over sublane-aligned (D is a multiple of 128) slices of projT.
    for n in range(N):
        p = projT[n * D:(n + 1) * D, :]                         # (D, TB)
        num = jnp.sum(p * candT, axis=0, keepdims=True)         # (1, TB)
        p_sq = jnp.sum(p * p, axis=0, keepdims=True)            # (1, TB)
        # num / max(|p|*|c|, eps)  ==  num * rsqrt(max(|p|^2 * |c|^2, eps^2))
        sim = num * jax.lax.rsqrt(jnp.maximum(p_sq * cand_sq, eps * eps))
        acc = acc + w_ref[0, n] * sim                           # scalar weight from SMEM

    out_ref[...] = acc + b_ref[0, 0]                            # lane-dense store


# ---------------------------------------------------------------------------
# Tiling / device helpers
# ---------------------------------------------------------------------------
def _ceil_to(x, m):
    return ((x + m - 1) // m) * m


def _cdiv(a, b):
    return (a + b - 1) // b


def _num_tensorcores():
    try:
        kind = jax.devices()[0].device_kind.lower()
    except Exception:
        return 1
    return 2 if "v7" in kind else 1


def _pick_tiling(B, *, max_tb=512):
    """Pick (batch tile, number of tiles).

    Large tiles amortize the ~0.35 us per-grid-step overhead. Multi-tile runs
    use a 128-multiple tile so the lane-dense (*, TB) blocks satisfy the TPU
    (8, 128) tiling constraint; on v7x we aim for >=2 tiles (one per core)
    whenever the batch is large enough.
    """
    cores = _num_tensorcores()
    min_tiles = cores if B >= cores * 128 else 1
    b_al = _ceil_to(B, 16)
    if min_tiles <= 1 and b_al <= max_tb:
        return b_al, 1
    n = max(_cdiv(B, max_tb), min_tiles)
    tb = min(_ceil_to(_cdiv(B, n), 128), _ceil_to(max_tb, 128))
    return tb, _cdiv(B, tb)


def _dim_semantics(n_tiles):
    # v7x has 2 TensorCores per chip: shard the batch-tile axis across them.
    if n_tiles >= 2 and _num_tensorcores() >= 2:
        return (pltpu.CORE_PARALLEL,)
    return ("parallel",)


# ---------------------------------------------------------------------------
# Weight prep (hoisted out of the per-call path)
# ---------------------------------------------------------------------------
def prepare_crim_params(emb_table, pad_idx, matrices, prob_w, prob_b,
                        *, mm_dtype=jnp.bfloat16, cand_dtype=jnp.float32):
    # v5e note: pass cand_dtype=jnp.bfloat16 to halve the largest per-tile DMA
    # stream (relax the tight tolerance check accordingly).
    N = matrices.shape[0]
    D = matrices.shape[-1]
    D_pad = _ceil_to(D, 128)

    emb = jnp.asarray(emb_table, jnp.float32)
    mats = jnp.asarray(matrices, jnp.float32).reshape(N, D, D)
    if D_pad != D:
        # Zero-padding the feature dim leaves dots / norms / cosines unchanged.
        emb = jnp.pad(emb, ((0, 0), (0, D_pad - D)))
        mats = jnp.pad(mats, ((0, 0), (0, D_pad - D), (0, D_pad - D)))

    mats_a = mats.reshape(N * D_pad, D_pad).astype(mm_dtype)   # A[n*D+i, j] = M[n, i, j]
    w2 = jnp.asarray(prob_w, jnp.float32).reshape(1, N)
    b2 = jnp.asarray(prob_b, jnp.float32).reshape(1, 1)
    return dict(emb=emb, pad_idx=pad_idx, mats=mats_a, w=w2, b=b2,
                n_matrices=N, d_pad=D_pad, mm_dtype=mm_dtype, cand_dtype=cand_dtype)


# ---------------------------------------------------------------------------
# Forward
# ---------------------------------------------------------------------------
def crim_forward(params, cand_idx, batch_idx):
    emb = params["emb"]
    pad_idx = params["pad_idx"]
    mats = params["mats"]
    w = params["w"]
    b = params["b"]
    N = params["n_matrices"]
    D = params["d_pad"]
    mm_dtype = params["mm_dtype"]
    cand_dtype = params["cand_dtype"]
    B = cand_idx.shape[0]

    # Embedding gather + masked *sum* pooling, produced already transposed
    # (D, B) so the kernel sees batch in the lane dimension. The /count
    # normalization of the original module cancels inside the cosine.
    # TODO(synk): fuse this gather + pooling into the Pallas kernel (DMA gather
    # driven by SMEM-prefetched indices) to avoid the (B, L, D) HBM round trip.
    def masked_sum_t(idx):
        mask = (idx != pad_idx).astype(jnp.float32)
        return jnp.einsum("bl,bld->db", mask, emb[idx])         # (D, B)

    candT = masked_sum_t(cand_idx).astype(cand_dtype)
    bembT = masked_sum_t(batch_idx).astype(mm_dtype)

    TB, n_tiles = _pick_tiling(B)
    B_pad = TB * n_tiles
    if B_pad != B:
        pad = ((0, 0), (0, B_pad - B))
        candT = jnp.pad(candT, pad)
        bembT = jnp.pad(bembT, pad)

    out_row = pl.pallas_call(
        crim_kernel,
        out_shape=jax.ShapeDtypeStruct((1, B_pad), jnp.float32),
        grid=(n_tiles,),
        in_specs=[
            pl.BlockSpec((D, TB), lambda i: (0, i)),            # pooled candidate (transposed)
            pl.BlockSpec((D, TB), lambda i: (0, i)),            # pooled context  (transposed)
            pl.BlockSpec((N * D, D), lambda i: (0, 0)),         # stacked matrices (resident)
            pl.BlockSpec((1, N), lambda i: (0, 0),
                         memory_space=pltpu.MemorySpace.SMEM),  # prob_layer weight
            pl.BlockSpec((1, 1), lambda i: (0, 0),
                         memory_space=pltpu.MemorySpace.SMEM),  # prob_layer bias
        ],
        out_specs=pl.BlockSpec((1, TB), lambda i: (0, i)),       # lane-dense logits row
        compiler_params=pltpu.CompilerParams(
            dimension_semantics=_dim_semantics(n_tiles)),
    )(candT, bembT, mats, w, b)

    return out_row[0, :B].reshape(B, 1)


# ---------------------------------------------------------------------------
# Test
# ---------------------------------------------------------------------------
if __name__ == "__main__":
    key = jax.random.PRNGKey(0)
    B, Lc, Lb = 4, 6, 8          # batch, candidate seq len, context seq len
    V, D, N = 32, 128, 5         # vocab size, embedding_dim, n_matrices
    pad_idx = 0
    sigma = 0.01

    k_emb, k_mat, k_w, k_b, k_ci, k_bi = jax.random.split(key, 6)

    # Deterministic parameter init mirroring the module's __init__.
    emb_table = 0.5 * jax.random.normal(k_emb, (V, D), dtype=jnp.float32)
    emb_table = emb_table.at[pad_idx].set(0.0)     # frozen pretrained table, zero pad row

    matrices = (jnp.eye(D, dtype=jnp.float32)[None, None, :, :]
                + sigma * jax.random.normal(k_mat, (N, 1, D, D), dtype=jnp.float32))
    prob_w = 0.1 * jax.random.normal(k_w, (1, N), dtype=jnp.float32)
    bound = 1.0 / (N ** 0.5)
    prob_b = jax.random.uniform(k_b, (1,), minval=-bound, maxval=bound, dtype=jnp.float32)

    # Inputs: token indices with explicit padding.
    cand_idx = jax.random.randint(k_ci, (B, Lc), 0, V)
    batch_idx = jax.random.randint(k_bi, (B, Lb), 0, V)
    cand_idx = cand_idx.at[:, Lc - 2:].set(pad_idx)
    batch_idx = batch_idx.at[:, Lb - 3:].set(pad_idx)

    params = prepare_crim_params(emb_table, pad_idx, matrices, prob_w, prob_b)
    logits = crim_forward(params, cand_idx, batch_idx)
    logits = jax.block_until_ready(logits)

    # ----- references -------------------------------------------------------
    mats_r = matrices.reshape(N, D, D)

    def masked_sum(idx):
        m = (idx != pad_idx).astype(jnp.float32)
        return jnp.einsum("bl,bld->bd", m, emb_table[idx])

    def masked_mean(idx):
        m = (idx != pad_idx).astype(jnp.float32)
        cnt = jnp.maximum(m.sum(axis=1, keepdims=True), 1.0)
        return masked_sum(idx) / cnt

    def cosine_logits(cand_v, bat_v, mats_v):
        proj = jnp.einsum("nij,bj->bni", mats_v, bat_v)                  # (B, N, D)
        num = jnp.sum(proj * cand_v[:, None, :], axis=-1)
        den = jnp.maximum(jnp.linalg.norm(proj, axis=-1)
                          * jnp.linalg.norm(cand_v, axis=-1, keepdims=True), 1e-8)
        sim = num / den                                                  # (B, N)
        return sim @ prob_w.reshape(1, N).T + prob_b.reshape(1, 1)       # (B, 1)

    # Exact original-module semantics (f32 everywhere, normalized means).
    ref_f32 = cosine_logits(masked_mean(cand_idx), masked_mean(batch_idx), mats_r)
    # Kernel-matched numerics (un-normalized sums, bf16-rounded matmul operands;
    # cosine similarity is scale-invariant, so dropping /count is exact).
    ref_bf16 = cosine_logits(masked_sum(cand_idx),
                             masked_sum(batch_idx).astype(jnp.bfloat16).astype(jnp.float32),
                             mats_r.astype(jnp.bfloat16).astype(jnp.float32))

    assert logits.shape == (B, 1), logits.shape
    # Tight check vs a reference using the same bf16-rounded matmul inputs.
    assert jnp.allclose(logits, ref_bf16, atol=2e-3, rtol=2e-3), (logits, ref_bf16)
    # Looser check vs the exact f32 module semantics (bf16 matmul precision).
    assert jnp.allclose(logits, ref_f32, atol=5e-2, rtol=5e-2), (logits, ref_f32)
    print("KERNEL_OK")
</pallas_src>

<mosaic_0001>
module attributes {stable_mosaic.version = 11 : i64} {
  func.func @crim_kernel(%arg0: i32, %arg1: memref<128x16xf32, #tpu.memory_space<vmem>>, %arg2: memref<128x16xbf16, #tpu.memory_space<vmem>>, %arg3: memref<640x128xbf16, #tpu.memory_space<vmem>>, %arg4: memref<1x5xf32, #tpu.memory_space<smem>>, %arg5: memref<1x1xf32, #tpu.memory_space<smem>>, %arg6: memref<1x16xf32, #tpu.memory_space<vmem>>) attributes {dimension_semantics = [#tpu.dimension_semantics<parallel>], iteration_bounds = array<i64: 1>, scalar_prefetch = 0 : i64, scratch_operands = 0 : i64, tpu.core_type = #tpu.core_type<tc>, window_params = [{transform_indices = @transform_0, window_bounds = array<i64: 128, 16>}, {transform_indices = @transform_1, window_bounds = array<i64: 128, 16>}, {pipeline_mode = #tpu.pipeline_mode<synchronous>, transform_indices = @transform_2, window_bounds = array<i64: 640, 128>}, {transform_indices = @transform_3, window_bounds = array<i64: 1, 5>}, {transform_indices = @transform_4, window_bounds = array<i64: 1, 1>}, {transform_indices = @transform_5, window_bounds = array<i64: 1, 16>}]} {
    %c0 = arith.constant 0 : index
    %c0_0 = arith.constant 0 : index
    %0 = vector.load %arg1[%c0, %c0_0] : memref<128x16xf32, #tpu.memory_space<vmem>>, vector<128x16xf32>
    %c0_1 = arith.constant 0 : index
    %c0_2 = arith.constant 0 : index
    %1 = vector.load %arg3[%c0_1, %c0_2] : memref<640x128xbf16, #tpu.memory_space<vmem>>, vector<640x128xbf16>
    %c0_3 = arith.constant 0 : index
    %c0_4 = arith.constant 0 : index
    %2 = vector.load %arg2[%c0_3, %c0_4] : memref<128x16xbf16, #tpu.memory_space<vmem>>, vector<128x16xbf16>
    %cst = arith.constant dense<0.000000e+00> : vector<640x16xf32>
    %3 = tpu.matmul %1, %2, %cst {dimension_numbers = #tpu.dot_dimension_numbers<[1], [0], [0], [1], [0, 0, 1, 1], [], []>} : vector<640x128xbf16>, vector<128x16xbf16>, vector<640x16xf32> -> vector<640x16xf32>
    %4 = arith.mulf %0, %0 : vector<128x16xf32>
    %cst_5 = arith.constant dense<0.000000e+00> : vector<16xf32>
    %5 = vector.multi_reduction <add>, %4, %cst_5 [0] : vector<128x16xf32> to vector<16xf32>
    %6 = vector.shape_cast %5 : vector<16xf32> to vector<1x16xf32>
    %cst_6 = arith.constant 0.000000e+00 : f32
    %7 = vector.broadcast %cst_6 : f32 to vector<1x16xf32>
    %8 = vector.extract_strided_slice %3 {offsets = [0, 0], sizes = [128, 16], strides = [1, 1]} : vector<640x16xf32> to vector<128x16xf32>
    %9 = arith.mulf %8, %0 : vector<128x16xf32>
    %cst_7 = arith.constant dense<0.000000e+00> : vector<16xf32>
    %10 = vector.multi_reduction <add>, %9, %cst_7 [0] : vector<128x16xf32> to vector<16xf32>
    %11 = vector.shape_cast %10 : vector<16xf32> to vector<1x16xf32>
    %12 = arith.mulf %8, %8 : vector<128x16xf32>
    %cst_8 = arith.constant dense<0.000000e+00> : vector<16xf32>
    %13 = vector.multi_reduction <add>, %12, %cst_8 [0] : vector<128x16xf32> to vector<16xf32>
    %14 = vector.shape_cast %13 : vector<16xf32> to vector<1x16xf32>
    %15 = arith.mulf %14, %6 : vector<1x16xf32>
    %cst_9 = arith.constant 1.000000e-16 : f32
    %16 = vector.broadcast %cst_9 : f32 to vector<1x16xf32>
    %17 = arith.maximumf %15, %16 : vector<1x16xf32>
    %18 = math.rsqrt %17 : vector<1x16xf32>
    %19 = arith.mulf %11, %18 : vector<1x16xf32>
    %c0_10 = arith.constant 0 : index
    %c0_11 = arith.constant 0 : index
    %20 = memref.load %arg4[%c0_10, %c0_11] : memref<1x5xf32, #tpu.memory_space<smem>>
    %21 = vector.broadcast %20 : f32 to vector<1x16xf32>
    %22 = arith.mulf %21, %19 : vector<1x16xf32>
    %23 = arith.addf %7, %22 : vector<1x16xf32>
    %24 = vector.extract_strided_slice %3 {offsets = [128, 0], sizes = [128, 16], strides = [1, 1]} : vector<640x16xf32> to vector<128x16xf32>
    %25 = arith.mulf %24, %0 : vector<128x16xf32>
    %cst_12 = arith.constant dense<0.000000e+00> : vector<16xf32>
    %26 = vector.multi_reduction <add>, %25, %cst_12 [0] : vector<128x16xf32> to vector<16xf32>
    %27 = vector.shape_cast %26 : vector<16xf32> to vector<1x16xf32>
    %28 = arith.mulf %24, %24 : vector<128x16xf32>
    %cst_13 = arith.constant dense<0.000000e+00> : vector<16xf32>
    %29 = vector.multi_reduction <add>, %28, %cst_13 [0] : vector<128x16xf32> to vector<16xf32>
    %30 = vector.shape_cast %29 : vector<16xf32> to vector<1x16xf32>
    %31 = arith.mulf %30, %6 : vector<1x16xf32>
    %cst_14 = arith.constant 1.000000e-16 : f32
    %32 = vector.broadcast %cst_14 : f32 to vector<1x16xf32>
    %33 = arith.maximumf %31, %32 : vector<1x16xf32>
    %34 = math.rsqrt %33 : vector<1x16xf32>
    %35 = arith.mulf %27, %34 : vector<1x16xf32>
    %c0_15 = arith.constant 0 : index
    %c1 = arith.constant 1 : index
    %36 = memref.load %arg4[%c0_15, %c1] : memref<1x5xf32, #tpu.memory_space<smem>>
    %37 = vector.broadcast %36 : f32 to vector<1x16xf32>
    %38 = arith.mulf %37, %35 : vector<1x16xf32>
    %39 = arith.addf %23, %38 : vector<1x16xf32>
    %40 = vector.extract_strided_slice %3 {offsets = [256, 0], sizes = [128, 16], strides = [1, 1]} : vector<640x16xf32> to vector<128x16xf32>
    %41 = arith.mulf %40, %0 : vector<128x16xf32>
    %cst_16 = arith.constant dense<0.000000e+00> : vector<16xf32>
    %42 = vector.multi_reduction <add>, %41, %cst_16 [0] : vector<128x16xf32> to vector<16xf32>
    %43 = vector.shape_cast %42 : vector<16xf32> to vector<1x16xf32>
    %44 = arith.mulf %40, %40 : vector<128x16xf32>
    %cst_17 = arith.constant dense<0.000000e+00> : vector<16xf32>
    %45 = vector.multi_reduction <add>, %44, %cst_17 [0] : vector<128x16xf32> to vector<16xf32>
    %46 = vector.shape_cast %45 : vector<16xf32> to vector<1x16xf32>
    %47 = arith.mulf %46, %6 : vector<1x16xf32>
    %cst_18 = arith.constant 1.000000e-16 : f32
    %48 = vector.broadcast %cst_18 : f32 to vector<1x16xf32>
    %49 = arith.maximumf %47, %48 : vector<1x16xf32>
    %50 = math.rsqrt %49 : vector<1x16xf32>
    %51 = arith.mulf %43, %50 : vector<1x16xf32>
    %c0_19 = arith.constant 0 : index
    %c2 = arith.constant 2 : index
    %52 = memref.load %arg4[%c0_19, %c2] : memref<1x5xf32, #tpu.memory_space<smem>>
    %53 = vector.broadcast %52 : f32 to vector<1x16xf32>
    %54 = arith.mulf %53, %51 : vector<1x16xf32>
    %55 = arith.addf %39, %54 : vector<1x16xf32>
    %56 = vector.extract_strided_slice %3 {offsets = [384, 0], sizes = [128, 16], strides = [1, 1]} : vector<640x16xf32> to vector<128x16xf32>
    %57 = arith.mulf %56, %0 : vector<128x16xf32>
    %cst_20 = arith.constant dense<0.000000e+00> : vector<16xf32>
    %58 = vector.multi_reduction <add>, %57, %cst_20 [0] : vector<128x16xf32> to vector<16xf32>
    %59 = vector.shape_cast %58 : vector<16xf32> to vector<1x16xf32>
    %60 = arith.mulf %56, %56 : vector<128x16xf32>
    %cst_21 = arith.constant dense<0.000000e+00> : vector<16xf32>
    %61 = vector.multi_reduction <add>, %60, %cst_21 [0] : vector<128x16xf32> to vector<16xf32>
    %62 = vector.shape_cast %61 : vector<16xf32> to vector<1x16xf32>
    %63 = arith.mulf %62, %6 : vector<1x16xf32>
    %cst_22 = arith.constant 1.000000e-16 : f32
    %64 = vector.broadcast %cst_22 : f32 to vector<1x16xf32>
    %65 = arith.maximumf %63, %64 : vector<1x16xf32>
    %66 = math.rsqrt %65 : vector<1x16xf32>
    %67 = arith.mulf %59, %66 : vector<1x16xf32>
    %c0_23 = arith.constant 0 : index
    %c3 = arith.constant 3 : index
    %68 = memref.load %arg4[%c0_23, %c3] : memref<1x5xf32, #tpu.memory_space<smem>>
    %69 = vector.broadcast %68 : f32 to vector<1x16xf32>
    %70 = arith.mulf %69, %67 : vector<1x16xf32>
    %71 = arith.addf %55, %70 : vector<1x16xf32>
    %72 = vector.extract_strided_slice %3 {offsets = [512, 0], sizes = [128, 16], strides = [1, 1]} : vector<640x16xf32> to vector<128x16xf32>
    %73 = arith.mulf %72, %0 : vector<128x16xf32>
    %cst_24 = arith.constant dense<0.000000e+00> : vector<16xf32>
    %74 = vector.multi_reduction <add>, %73, %cst_24 [0] : vector<128x16xf32> to vector<16xf32>
    %75 = vector.shape_cast %74 : vector<16xf32> to vector<1x16xf32>
    %76 = arith.mulf %72, %72 : vector<128x16xf32>
    %cst_25 = arith.constant dense<0.000000e+00> : vector<16xf32>
    %77 = vector.multi_reduction <add>, %76, %cst_25 [0] : vector<128x16xf32> to vector<16xf32>
    %78 = vector.shape_cast %77 : vector<16xf32> to vector<1x16xf32>
    %79 = arith.mulf %78, %6 : vector<1x16xf32>
    %cst_26 = arith.constant 1.000000e-16 : f32
    %80 = vector.broadcast %cst_26 : f32 to vector<1x16xf32>
    %81 = arith.maximumf %79, %80 : vector<1x16xf32>
    %82 = math.rsqrt %81 : vector<1x16xf32>
    %83 = arith.mulf %75, %82 : vector<1x16xf32>
    %c0_27 = arith.constant 0 : index
    %c4 = arith.constant 4 : index
    %84 = memref.load %arg4[%c0_27, %c4] : memref<1x5xf32, #tpu.memory_space<smem>>
    %85 = vector.broadcast %84 : f32 to vector<1x16xf32>
    %86 = arith.mulf %85, %83 : vector<1x16xf32>
    %87 = arith.addf %71, %86 : vector<1x16xf32>
    %c0_28 = arith.constant 0 : index
    %c0_29 = arith.constant 0 : index
    %88 = memref.load %arg5[%c0_28, %c0_29] : memref<1x1xf32, #tpu.memory_space<smem>>
    %89 = vector.broadcast %88 : f32 to vector<1x16xf32>
    %90 = arith.addf %87, %89 : vector<1x16xf32>
    %c0_30 = arith.constant 0 : index
    %c0_31 = arith.constant 0 : index
    %91 = vector.load %arg6[%c0_30, %c0_31] : memref<1x16xf32, #tpu.memory_space<vmem>>, vector<1x16xf32>
    tpu.vector_store %arg6[%c0_30, %c0_31], %90 {strides = array<i32>} : memref<1x16xf32, #tpu.memory_space<vmem>>, vector<1x16xf32>,
    return
  }
  func.func @transform_0(%arg0: i32) -> (i32, i32) {
    %c0_i32 = arith.constant 0 : i32
    %c0_i32_0 = arith.constant 0 : i32
    return %c0_i32, %arg0 : i32, i32
  }
  func.func @transform_1(%arg0: i32) -> (i32, i32) {
    %c0_i32 = arith.constant 0 : i32
    %c0_i32_0 = arith.constant 0 : i32
    return %c0_i32, %arg0 : i32, i32
  }
  func.func @transform_2(%arg0: i32) -> (i32, i32) {
    %c0_i32 = arith.constant 0 : i32
    %c0_i32_0 = arith.constant 0 : i32
    %c0_i32_1 = arith.constant 0 : i32
    return %c0_i32, %c0_i32_0 : i32, i32
  }
  func.func @transform_3(%arg0: i32) -> (i32, i32) {
    %c0_i32 = arith.constant 0 : i32
    %c0_i32_0 = arith.constant 0 : i32
    %c0_i32_1 = arith.constant 0 : i32
    return %c0_i32, %c0_i32_0 : i32, i32
  }
  func.func @transform_4(%arg0: i32) -> (i32, i32) {
    %c0_i32 = arith.constant 0 : i32
    %c0_i32_0 = arith.constant 0 : i32
    %c0_i32_1 = arith.constant 0 : i32
    return %c0_i32, %c0_i32_0 : i32, i32
  }
  func.func @transform_5(%arg0: i32) -> (i32, i32) {
    %c0_i32 = arith.constant 0 : i32
    %c0_i32_0 = arith.constant 0 : i32
    return %c0_i32, %arg0 : i32, i32
  }
}

</mosaic_0001>

<bundles_post_ra>
// kernel: tpu_custom_call.1
= control target key start
LH: loop header
LB: loop body
LE: loop exit
PB: predicated region body
PF: predicated region fallthrough
CT: control target
= control target key end

     0   :  { %11 = vsyncpa [#allocation4], 0  ;;  %s2602_s0 = inlined_call_operand.vmem [shape: f32[128,16], index: 0, kind: input, shape index: {}]   ;;  %s2603_s1 = inlined_call_operand.vmem [shape: bf16[128,16], index: 1, kind: input, shape index: {}]   ;;  %s2604_s2 = inlined_call_operand.hbm [shape: bf16[640,128], index: 2, kind: input, shape index: {}]   ;;  %s2605_s3 = inlined_call_operand.vmem [shape: f32[1,5], index: 3, kind: input, shape index: {}]   ;;  %s2606_s4 = inlined_call_operand.<no memory space> [shape: f32[1,1], index: 4, kind: input, shape index: {}]   ;;  %s2607_s5 = inlined_call_operand.hbm [shape: f32[1,16], index: 5, kind: output, shape index: {}]  }
   0x1   :  { %12 = vsyncpa [#allocation6], 0 }
   0x2   :  { %13 = vsyncpa [#allocation5], 0  ;;  %s1789_s18 = smov [#allocation3]   ;;  %s36_s22 = sshll.u32 %s2605_s3, 4  ;;  %s37_s22 = int_to_ptr.vmem [resolvable:$true] %s36_s22 }
   0x3   :  { %s23_s19 = sshll.u32 %s1789_s18, 4  ;;  %s24_s19 = int_to_ptr.vmem [resolvable:$true] %s23_s19 }
   0x4   :  { %s1739_s23 = scalar_lea.vmem %s24_s19, 5120  ;;  %p1744_p1 = scmp.lt.s32.totalorder %s24_s19, %s24_s19 }
   0x5   :  { %p1740_p0 = scmp.ne.s32.totalorder %s24_s19, %s1739_s23  ;;  %p1745_p2 = scmp.lt.s32.totalorder %s1739_s23, %s1739_s23 }
   0x7   :  { %p1746_p3 = por %p1745_p2, %p1744_p1 }
   0x9   :  { %p1747_p4 = pnand %p1746_p3, %p1740_p0 }
   0xb   :  { %1750 = shalt.err (!%p1747_p4)
}
   0xc   :  { %s1790_s24 = smov 64   ;;  %s1791_s25 = smov 4  }
   0xd   :  { %29 = dma.hbm_to_vmem [thread:$0]  %s2604_s2, 5120, %s24_s19, [#allocation4], %s1790_s24, %s1790_s24, %s1791_s25  }
   0xe   :  { %s1751_s28 = scalar_lea.vmem %s37_s22, 16  ;;  %p1756_p6 = scmp.lt.s32.totalorder %s37_s22, %s37_s22 }
   0xf   :  { %p1752_p5 = scmp.ne.s32.totalorder %s37_s22, %s1751_s28  ;;  %p1757_p7 = scmp.lt.s32.totalorder %s1751_s28, %s1751_s28 }
  0x11   :  { %p1758_p8 = por %p1757_p7, %p1756_p6 }
  0x13   :  { %p1759_p9 = pnand %p1758_p8, %p1752_p5 }
  0x15   :  { %1762 = shalt.err (!%p1759_p9)
}
  0x16   :  { %s1792_s3 = smov [#allocation7]  }
  0x17   :  { %39 = dma.vmem_to_smem %s37_s22, 16, %s1792_s3, [#allocation6]  }
  0x18   :  { %1783 = dma.done.wait [#allocation4], 5120  }
  0x19   :  { %1784 = vsyncadd [#allocation4], 4294962176 }
  0x1a   :  { %1785 = dma.done.wait [#allocation6], 16  }
  0x1b   :  { %1786 = vsyncadd [#allocation6], 4294967280 }
  0x1c   :  { %48 = sfence }
  0x1d   :  { %v1665_v0 = vld [vmem:[%s2603_s1 + $0x38] sm:$0xff]   ;;  %v1666_v1 = vld [vmem:[%s2603_s1 + $0x30] sm:$0xff]   ;;  %v1667_v2 = vld [vmem:[%s2603_s1 + $0x28] sm:$0xff]   ;;  %vm819_vm0 = vcmask 130048   ;;  %s967_s11 = sld [smem:[#allocation7]]  ;;  %s1793_s17 = smov [#allocation8]  }
  0x1e   :  { %1548 = vmatprep.subr.bf16.mxu0 %v1665_v0  ;;  %1644 = vmatprep.subr.bf16.mxu1 %v1665_v0  ;;  %v1668_v3 = vld [vmem:[%s2603_s1 + $0x20] sm:$0xff]   ;;  %v1669_v6 = vld [vmem:[%s2603_s1 + $0x18] sm:$0xff]   ;;  %v1670_v7 = vld [vmem:[%s2603_s1 + $0x10] sm:$0xff]   ;;  %s1497_s12 = sld [smem:[#allocation7 + $0x2]]  ;;  %s1438_s18 = sshll.u32 %s1793_s17, 4  ;;  %vm1430_vm1 = vcmask 122880   ;;  %s1439_s18 = int_to_ptr.vmem [resolvable:$true] %s1438_s18 }
  0x1f   :  { %1549 = vmatpush3.bf16.msra.mxu0 %v1665_v0  ;;  %1652 = vmatpush3.bf16.msra.mxu1 %v1665_v0  ;;  %v1673_v4 = vld [vmem:[#allocation3] sm:$0xff]   ;;  %v1671_v8 = vld [vmem:[%s2603_s1 + $0x8] sm:$0xff]   ;;  %v1677_v12 = vld [vmem:[#allocation3 + $0x10] sm:$0xff]   ;;  %s1498_s13 = sld [smem:[#allocation7 + $0x3]]  ;;  %s1767_s19 = scalar_lea.vmem %s1439_s18, 32 }
  0x20   :  { %1550 = vmatprep.subr.bf16.mxu0 %v1666_v1  ;;  %1645 = vmatprep.subr.bf16.mxu1 %v1666_v1  ;;  %v1674_v5 = vld [vmem:[#allocation3 + $0xa0] sm:$0xff]   ;;  %v1675_v10 = vld [vmem:[#allocation3 + $0x8] sm:$0xff]   ;;  %v1678_v13 = vld [vmem:[#allocation3 + $0xb0] sm:$0xff]   ;;  %s1499_s14 = sld [smem:[#allocation7 + $0x4]]  ;;  %p1768_p11 = scmp.lt.s32.totalorder %s1439_s18, %s1439_s18 }
  0x21   :  { %1564 = vmatprep.mubr.bf16.mxu0 %v1673_v4  ;;  %1604 = vmatprep.mubr.bf16.mxu1 %v1674_v5  ;;  %v1672_v9 = vld [vmem:[%s2603_s1] sm:$0xff]   ;;  %v1676_v11 = vld [vmem:[#allocation3 + $0xa8] sm:$0xff]   ;;  %v1679_v14 = vld [vmem:[#allocation3 + $0x18] sm:$0xff]   ;;  %s1763_s1 = scalar_lea.vmem %s1439_s18, 16 }
  0x22   :  { %v1680_v15 = vld [vmem:[#allocation3 + $0xb8] sm:$0xff]   ;;  %v1681_v16 = vld [vmem:[#allocation3 + $0x20] sm:$0xff]   ;;  %v1683_v18 = vld [vmem:[#allocation3 + $0x28] sm:$0xff]   ;;  %p1764_p10 = scmp.ne.s32.totalorder %s1439_s18, %s1763_s1  ;;  %p1769_p12 = scmp.lt.s32.totalorder %s1767_s19, %s1763_s1 }
  0x23   :  { %1551 = vmatpush3.bf16.msra.mxu0 %v1666_v1  ;;  %1653 = vmatpush3.bf16.msra.mxu1 %v1666_v1  ;;  %v1682_v17 = vld [vmem:[#allocation3 + $0xc0] sm:$0xff]   ;;  %v1684_v19 = vld [vmem:[#allocation3 + $0xc8] sm:$0xff]   ;;  %v1685_v20 = vld [vmem:[#allocation3 + $0x30] sm:$0xff]  }
  0x24   :  { %1552 = vmatprep.subr.bf16.mxu0 %v1667_v2  ;;  %1646 = vmatprep.subr.bf16.mxu1 %v1667_v2  ;;  %v1686_v21 = vld [vmem:[#allocation3 + $0xd0] sm:$0xff]   ;;  %v1687_v22 = vld [vmem:[#allocation3 + $0x38] sm:$0xff]   ;;  %v1689_v24 = vld [vmem:[#allocation3 + $0x40] sm:$0xff]   ;;  %p1770_p13 = por %p1769_p12, %p1768_p11 }
  0x25   :  { %v1688_v23 = vld [vmem:[#allocation3 + $0xd8] sm:$0xff]   ;;  %v1690_v25 = vld [vmem:[#allocation3 + $0xe0] sm:$0xff]   ;;  %v1691_v26 = vld [vmem:[#allocation3 + $0x48] sm:$0xff]  }
  0x26   :  { %v1692_v27 = vld [vmem:[#allocation3 + $0xe8] sm:$0xff]   ;;  %v1693_v28 = vld [vmem:[#allocation3 + $0x50] sm:$0xff]   ;;  %v1695_v30 = vld [vmem:[#allocation3 + $0x58] sm:$0xff]   ;;  %p1771_p0 = pnand %p1770_p13, %p1764_p10 }
  0x27   :  { %1553 = vmatpush3.bf16.msra.mxu0 %v1667_v2  ;;  %1654 = vmatpush3.bf16.msra.mxu1 %v1667_v2  ;;  %v1694_v29 = vld [vmem:[#allocation3 + $0xf0] sm:$0xff]   ;;  %v1696_v31 = vld [vmem:[#allocation3 + $0xf8] sm:$0xff]   ;;  %v1697_v32 = vld [vmem:[#allocation3 + $0x60] sm:$0xff]  }
  0x28   :  { %1554 = vmatprep.subr.bf16.mxu0 %v1668_v3  ;;  %1647 = vmatprep.subr.bf16.mxu1 %v1668_v3  ;;  %v1698_v33 = vld [vmem:[#allocation3 + $0x100] sm:$0xff]   ;;  %v1699_v34 = vld [vmem:[#allocation3 + $0x68] sm:$0xff]   ;;  %v1701_v36 = vld [vmem:[#allocation3 + $0x70] sm:$0xff]  }
  0x29   :  { %v1700_v35 = vld [vmem:[#allocation3 + $0x108] sm:$0xff]   ;;  %v1702_v37 = vld [vmem:[#allocation3 + $0x110] sm:$0xff]   ;;  %v1703_v38 = vld [vmem:[#allocation3 + $0x78] sm:$0xff]  }
  0x2a   :  { %v1704_v39 = vld [vmem:[#allocation3 + $0x118] sm:$0xff]   ;;  %v1705_v40 = vld [vmem:[#allocation3 + $0x80] sm:$0xff]   ;;  %v1707_v42 = vld [vmem:[#allocation3 + $0x88] sm:$0xff]  }
  0x2b   :  { %1555 = vmatpush3.bf16.msra.mxu0 %v1668_v3  ;;  %1655 = vmatpush3.bf16.msra.mxu1 %v1668_v3  ;;  %v1706_v41 = vld [vmem:[#allocation3 + $0x120] sm:$0xff]   ;;  %v1708_v43 = vld [vmem:[#allocation3 + $0x128] sm:$0xff]   ;;  %v1709_v44 = vld [vmem:[#allocation3 + $0x90] sm:$0xff]  }
  0x2c   :  { %1556 = vmatprep.subr.bf16.mxu0 %v1669_v6  ;;  %1648 = vmatprep.subr.bf16.mxu1 %v1669_v6  ;;  %v1710_v45 = vld [vmem:[#allocation3 + $0x130] sm:$0xff]   ;;  %v1711_v46 = vld [vmem:[#allocation3 + $0x98] sm:$0xff]   ;;  %v1857_v48 = vld [vmem:[%s2602_s0 + $0x8] sm:$0xff] }
  0x2d   :  { %v1712_v47 = vld [vmem:[#allocation3 + $0x138] sm:$0xff]   ;;  %v1862_v49 = vld [vmem:[%s2602_s0] sm:$0xff]  ;;  %v804_v51 = vmul.f32 %v1857_v48, %v1857_v48  ;;  %v1871_v52 = vld [vmem:[%s2602_s0 + $0x10] sm:$0xff] }
  0x2e   :  { %v803_v50 = vmul.f32 %v1862_v49, %v1862_v49  ;;  %v805_v53 = vmul.f32 %v1871_v52, %v1871_v52  ;;  %v1880_v56 = vld [vmem:[%s2602_s0 + $0x18] sm:$0xff]  ;;  %v1888_v61 = vld [vmem:[%s2602_s0 + $0x20] sm:$0xff]  ;;  %v1896_v0 = vld [vmem:[%s2602_s0 + $0x28] sm:$0xff] }
  0x2f   :  { %1557 = vmatpush3.bf16.msra.mxu0 %v1669_v6  ;;  %1656 = vmatpush3.bf16.msra.mxu1 %v1669_v6  ;;  %v821_v55 = vsel %vm819_vm0, %v804_v51, 0.0  ;;  %v806_v59 = vmul.f32 %v1880_v56, %v1880_v56  ;;  %v807_v63 = vmul.f32 %v1888_v61, %v1888_v61  ;;  %v808_v3 = vmul.f32 %v1896_v0, %v1896_v0  ;;  %v1904_v4 = vld [vmem:[%s2602_s0 + $0x30] sm:$0xff] }
  0x30   :  { %1558 = vmatprep.subr.bf16.mxu0 %v1670_v7  ;;  %1649 = vmatprep.subr.bf16.mxu1 %v1670_v7  ;;  %v820_v54 = vsel %vm819_vm0, %v803_v50, 0.0  ;;  %v823_v58 = vsel %vm819_vm0, %v805_v53, 0.0  ;;  %v809_v6 = vmul.f32 %v1904_v4, %v1904_v4 }
  0x31   :  { %v822_v57 = vadd.f32 %v821_v55, %v820_v54  ;;  %v825_v62 = vsel %vm819_vm0, %v806_v59, 0.0  ;;  %v827_v2 = vsel %vm819_vm0, %v807_v63, 0.0 }
  0x33   :  { %1559 = vmatpush3.bf16.msra.mxu0 %v1670_v7  ;;  %1657 = vmatpush3.bf16.msra.mxu1 %v1670_v7  ;;  %v824_v60 = vadd.f32 %v823_v58, %v822_v57  ;;  %v829_v7 = vsel %vm819_vm0, %v808_v3, 0.0 }
  0x34   :  { %1560 = vmatprep.subr.bf16.mxu0 %v1671_v8  ;;  %1650 = vmatprep.subr.bf16.mxu1 %v1671_v8 }
  0x35   :  { %v826_v1 = vadd.f32 %v825_v62, %v824_v60 }
  0x37   :  { %1561 = vmatpush3.bf16.msra.mxu0 %v1671_v8  ;;  %1658 = vmatpush3.bf16.msra.mxu1 %v1671_v8  ;;  %v828_v5 = vadd.f32 %v827_v2, %v826_v1  ;;  %v1912_v8 = vld [vmem:[%s2602_s0 + $0x38] sm:$0xff] }
  0x38   :  { %1562 = vmatprep.subr.bf16.mxu0 %v1672_v9  ;;  %1651 = vmatprep.subr.bf16.mxu1 %v1672_v9 }
  0x3b   :  { %1563 = vmatpush3.bf16.msra.mxu0 %v1672_v9  ;;  %1659 = vmatpush3.bf16.msra.mxu1 %v1672_v9  ;;  %v830_v9 = vadd.f32 %v829_v7, %v828_v5 }
  0x3e   :  { %1565 = vmatmul.mubr.bf16.vlgmr.msra.gmra.mxu0 %v1675_v10  ;;  %1605 = vmatmul.mubr.bf16.vlgmr.msra.gmra.mxu1 %v1676_v11  ;;  %v831_v10 = vsel %vm819_vm0, %v809_v6, 0.0  ;;  %v810_v11 = vmul.f32 %v1912_v8, %v1912_v8 }
  0x3f   :  { %1568 = vmatprep.mubr.bf16.mxu0 %v1677_v12  ;;  %1608 = vmatprep.mubr.bf16.mxu1 %v1678_v13  ;;  %v1920_v12 = vld [vmem:[%s2602_s0 + $0x40] sm:$0xff]  ;;  %v832_v13 = vadd.f32 %v831_v10, %v830_v9 }
  0x46   :  { %1569 = vmatmul.mubr.bf16.gmra.mxu0 %v1679_v14  ;;  %1609 = vmatmul.mubr.bf16.gmra.mxu1 %v1680_v15  ;;  %v811_v14 = vmul.f32 %v1920_v12, %v1920_v12  ;;  %v833_v15 = vsel %vm819_vm0, %v810_v11, 0.0 }
  0x47   :  { %1572 = vmatprep.mubr.bf16.mxu0 %v1681_v16  ;;  %1612 = vmatprep.mubr.bf16.mxu1 %v1682_v17  ;;  %v1928_v16 = vld [vmem:[%s2602_s0 + $0x48] sm:$0xff]  ;;  %v834_v17 = vadd.f32 %v833_v15, %v832_v13 }
  0x4e   :  { %1573 = vmatmul.mubr.bf16.gmra.mxu0 %v1683_v18  ;;  %1613 = vmatmul.mubr.bf16.gmra.mxu1 %v1684_v19  ;;  %v835_v18 = vsel %vm819_vm0, %v811_v14, 0.0  ;;  %v812_v19 = vmul.f32 %v1928_v16, %v1928_v16 }
  0x4f   :  { %1576 = vmatprep.mubr.bf16.mxu0 %v1685_v20  ;;  %1616 = vmatprep.mubr.bf16.mxu1 %v1686_v21  ;;  %v1936_v20 = vld [vmem:[%s2602_s0 + $0x50] sm:$0xff]  ;;  %v836_v21 = vadd.f32 %v835_v18, %v834_v17 }
  0x56   :  { %1577 = vmatmul.mubr.bf16.gmra.mxu0 %v1687_v22  ;;  %1617 = vmatmul.mubr.bf16.gmra.mxu1 %v1688_v23  ;;  %v813_v22 = vmul.f32 %v1936_v20, %v1936_v20  ;;  %v837_v23 = vsel %vm819_vm0, %v812_v19, 0.0 }
  0x57   :  { %1580 = vmatprep.mubr.bf16.mxu0 %v1689_v24  ;;  %1620 = vmatprep.mubr.bf16.mxu1 %v1690_v25  ;;  %v1944_v24 = vld [vmem:[%s2602_s0 + $0x58] sm:$0xff]  ;;  %v838_v25 = vadd.f32 %v837_v23, %v836_v21 }
  0x58   :  { %v2002_v23 = vld [vmem:[%s2602_s0 + $0x78] sm:$0xff] }
  0x5e   :  { %1581 = vmatmul.mubr.bf16.gmra.mxu0 %v1691_v26  ;;  %1621 = vmatmul.mubr.bf16.gmra.mxu1 %v1692_v27  ;;  %v839_v26 = vsel %vm819_vm0, %v813_v22, 0.0  ;;  %v814_v27 = vmul.f32 %v1944_v24, %v1944_v24 }
  0x5f   :  { %1584 = vmatprep.mubr.bf16.mxu0 %v1693_v28  ;;  %1624 = vmatprep.mubr.bf16.mxu1 %v1694_v29  ;;  %v1952_v28 = vld [vmem:[%s2602_s0 + $0x60] sm:$0xff]  ;;  %v840_v29 = vadd.f32 %v839_v26, %v838_v25 }
  0x66   :  { %1585 = vmatmul.mubr.bf16.gmra.mxu0 %v1695_v30  ;;  %1625 = vmatmul.mubr.bf16.gmra.mxu1 %v1696_v31 }
  0x67   :  { %1588 = vmatprep.mubr.bf16.mxu0 %v1697_v32  ;;  %1628 = vmatprep.mubr.bf16.mxu1 %v1698_v33  ;;  %v841_v32 = vsel %vm819_vm0, %v814_v27, 0.0  ;;  %v815_v33 = vmul.f32 %v1952_v28, %v1952_v28  ;;  %v818_v27 = vmul.f32 %v2002_v23, %v2002_v23 }
  0x6e   :  { %1589 = vmatmul.mubr.bf16.gmra.mxu0 %v1699_v34  ;;  %1629 = vmatmul.mubr.bf16.gmra.mxu1 %v1700_v35 }
  0x6f   :  { %1592 = vmatprep.mubr.bf16.mxu0 %v1701_v36  ;;  %1632 = vmatprep.mubr.bf16.mxu1 %v1702_v37  ;;  %v1964_v36 = vld [vmem:[%s2602_s0 + $0x68] sm:$0xff] }
  0x70   :  { %v816_v37 = vmul.f32 %v1964_v36, %v1964_v36 }
  0x72   :  { %v845_v51 = vsel %vm819_vm0, %v816_v37, 0.0 }
  0x76   :  { %1593 = vmatmul.mubr.bf16.gmra.mxu0 %v1703_v38  ;;  %1633 = vmatmul.mubr.bf16.gmra.mxu1 %v1704_v39  ;;  %v842_v38 = vadd.f32 %v841_v32, %v840_v29 }
  0x77   :  { %1596 = vmatprep.mubr.bf16.mxu0 %v1705_v40  ;;  %1636 = vmatprep.mubr.bf16.mxu1 %v1706_v41  ;;  %v843_v41 = vsel %vm819_vm0, %v815_v33, 0.0 }
  0x78   :  { %v844_v50 = vadd.f32 %v843_v41, %v842_v38 }
  0x7a   :  { %v846_v11 = vadd.f32 %v845_v51, %v844_v50 }
  0x7e   :  { %1597 = vmatmul.mubr.bf16.gmra.mxu0 %v1707_v42  ;;  %1637 = vmatmul.mubr.bf16.gmra.mxu1 %v1708_v43 }
  0x7f   :  { %1600 = vmatprep.mubr.bf16.mxu0 %v1709_v44  ;;  %1640 = vmatprep.mubr.bf16.mxu1 %v1710_v45 }
  0x86   :  { %1601 = vmatmul.mubr.bf16.gmra.mxu0 %v1711_v46  ;;  %1641 = vmatmul.mubr.bf16.gmra.mxu1 %v1712_v47  ;;  %v1977_v46 = vld [vmem:[%s2602_s0 + $0x70] sm:$0xff] }
  0x87   :  { %v817_v47 = vmul.f32 %v1977_v46, %v1977_v46 }
  0x89   :  { %v847_v10 = vsel %vm819_vm0, %v817_v47, 0.0 }
  0xfe   :  { %v1566_v30 = vpop.f32.mrf.mxu0  ;;  %v1954_v31 = vpop.f32.mrf.mxu1 }
  0xff   :  { %v859_v53 = vmul.f32 %v1566_v30, %v1871_v52  ;;  %v912_v54 = vmul.f32 %v1566_v30, %v1566_v30 }
 0x100   :  { %v484_v34 = vpop.f32.mrf.mxu0  ;;  %v1959_v35 = vpop.f32.mrf.mxu1 }
 0x101   :  { %v857_v42 = vmul.f32 %v484_v34, %v1862_v49  ;;  %v910_v43 = vmul.f32 %v484_v34, %v484_v34  ;;  %v876_v13 = vsel %vm819_vm0, %v859_v53, 0.0  ;;  %v929_v14 = vsel %vm819_vm0, %v912_v54, 0.0 }
 0x102   :  { %v1567_v39 = vpop.f32.mrf.mxu0  ;;  %v1968_v40 = vpop.f32.mrf.mxu1  ;;  %v848_v34 = vadd.f32 %v847_v10, %v846_v11  ;;  %v849_v53 = vsel %vm819_vm0, %v818_v27, 0.0 }
 0x103   :  { %v860_v60 = vmul.f32 %v1567_v39, %v1880_v56  ;;  %v913_v62 = vmul.f32 %v1567_v39, %v1567_v39  ;;  %v873_v63 = vsel %vm819_vm0, %v857_v42, 0.0  ;;  %v926_v1 = vsel %vm819_vm0, %v910_v43, 0.0 }
 0x104   :  { %v487_v44 = vpop.f32.mrf.mxu0  ;;  %v1972_v45 = vpop.f32.mrf.mxu1 }
 0x105   :  { %v858_v55 = vmul.f32 %v487_v44, %v1857_v48  ;;  %v911_v57 = vmul.f32 %v487_v44, %v487_v44  ;;  %v878_v25 = vsel %vm819_vm0, %v860_v60, 0.0  ;;  %v931_v26 = vsel %vm819_vm0, %v913_v62, 0.0 }
 0x106   :  { %v1570_v58 = vpop.f32.mrf.mxu0  ;;  %v1984_v59 = vpop.f32.mrf.mxu1 }
 0x107   :  { %v874_v2 = vsel %vm819_vm0, %v858_v55, 0.0  ;;  %v927_v3 = vsel %vm819_vm0, %v911_v57, 0.0  ;;  %v863_v37 = vmul.f32 %v1570_v58, %v1904_v4  ;;  %v916_v38 = vmul.f32 %v1570_v58, %v1570_v58 }
 0x108   :  { %v500_v5 = vpop.f32.mrf.mxu0  ;;  %v1991_v6 = vpop.f32.mrf.mxu1  ;;  %v875_v7 = vadd.f32 %v874_v2, %v873_v63  ;;  %v928_v9 = vadd.f32 %v927_v3, %v926_v1 }
 0x109   :  { %v861_v15 = vmul.f32 %v500_v5, %v1888_v61  ;;  %v914_v17 = vmul.f32 %v500_v5, %v500_v5  ;;  %v884_v5 = vsel %vm819_vm0, %v863_v37, 0.0 }
 0x10a   :  { %v1571_v18 = vpop.f32.mrf.mxu0  ;;  %v1997_v19 = vpop.f32.mrf.mxu1  ;;  %v877_v21 = vadd.f32 %v876_v13, %v875_v7  ;;  %v930_v22 = vadd.f32 %v929_v14, %v928_v9  ;;  %v937_v7 = vsel %vm819_vm0, %v916_v38, 0.0  ;;  %v850_v9 = vadd.f32 %v849_v53, %v848_v34 }
 0x10b   :  { %v880_v39 = vsel %vm819_vm0, %v861_v15, 0.0  ;;  %v933_v41 = vsel %vm819_vm0, %v914_v17, 0.0  ;;  %v864_v57 = vmul.f32 %v1571_v18, %v1912_v8  ;;  %v917_v58 = vmul.f32 %v1571_v18, %v1571_v18 }
 0x10c   :  { %v503_v29 = vpop.f32.mrf.mxu0  ;;  %v2008_v30 = vpop.f32.mrf.mxu1  ;;  %v879_v32 = vadd.f32 %v878_v25, %v877_v21  ;;  %v932_v33 = vadd.f32 %v931_v26, %v930_v22 }
 0x10d   :  { %v862_v50 = vmul.f32 %v503_v29, %v1896_v0  ;;  %v915_v51 = vmul.f32 %v503_v29, %v503_v29  ;;  %v886_v18 = vsel %vm819_vm0, %v864_v57, 0.0  ;;  %v939_v21 = vsel %vm819_vm0, %v917_v58, 0.0 }
 0x10e   :  { %v1574_v42 = vpop.f32.mrf.mxu0  ;;  %v2013_v43 = vpop.f32.mrf.mxu1  ;;  %v881_v44 = vadd.f32 %v880_v39, %v879_v32  ;;  %v934_v47 = vadd.f32 %v933_v41, %v932_v33  ;;  %v851_v33 = vrot.slane %v850_v9, 4 }
 0x10f   :  { %v882_v60 = vsel %vm819_vm0, %v862_v50, 0.0  ;;  %v935_v62 = vsel %vm819_vm0, %v915_v51, 0.0  ;;  %v867_v41 = vmul.f32 %v1574_v42, %v1936_v20 }
 0x110   :  { %v516_v54 = vpop.f32.mrf.mxu0  ;;  %v2017_v55 = vpop.f32.mrf.mxu1  ;;  %v883_v63 = vadd.f32 %v882_v60, %v881_v44  ;;  %v936_v1 = vadd.f32 %v935_v62, %v934_v47  ;;  %v920_v44 = vmul.f32 %v1574_v42, %v1574_v42 }
 0x111   :  { %v865_v13 = vmul.f32 %v516_v54, %v1920_v12  ;;  %v918_v14 = vmul.f32 %v516_v54, %v516_v54  ;;  %v892_v42 = vsel %vm819_vm0, %v867_v41, 0.0 }
 0x112   :  { %v1575_v2 = vpop.f32.mrf.mxu0  ;;  %v2022_v3 = vpop.f32.mrf.mxu1  ;;  %v885_v10 = vadd.f32 %v884_v5, %v883_v63  ;;  %v938_v11 = vadd.f32 %v937_v7, %v936_v1  ;;  %v852_v7 = vadd.f32 %v851_v33, %v850_v9 }
 0x113   :  { %v888_v29 = vsel %vm819_vm0, %v865_v13, 0.0  ;;  %v941_v32 = vsel %vm819_vm0, %v918_v14, 0.0  ;;  %v868_v54 = vmul.f32 %v1575_v2, %v1944_v24  ;;  %v921_v57 = vmul.f32 %v1575_v2, %v1575_v2 }
 0x114   :  { %v519_v15 = vpop.f32.mrf.mxu0  ;;  %v679_v17 = vpop.f32.mrf.mxu1  ;;  %v887_v22 = vadd.f32 %v886_v18, %v885_v10  ;;  %v940_v25 = vadd.f32 %v939_v21, %v938_v11  ;;  %v945_v10 = vsel %vm819_vm0, %v920_v44, 0.0  ;;  %v853_v33 = vrot.slane %v852_v7, 2 }
 0x115   :  { %v866_v47 = vmul.f32 %v519_v15, %v1928_v16  ;;  %v919_v50 = vmul.f32 %v519_v15, %v519_v15  ;;  %v894_v2 = vsel %vm819_vm0, %v868_v54, 0.0  ;;  %v947_v18 = vsel %vm819_vm0, %v921_v57, 0.0 }
 0x116   :  { %v1578_v26 = vpop.f32.mrf.mxu0  ;;  %v2029_v27 = vpop.f32.mrf.mxu1  ;;  %v889_v34 = vadd.f32 %v888_v29, %v887_v22  ;;  %v942_v37 = vadd.f32 %v941_v32, %v940_v25  ;;  %v1253_v54 = vmul.f32 %v679_v17, %v679_v17 }
 0x117   :  { %v890_v58 = vsel %vm819_vm0, %v866_v47, 0.0  ;;  %v943_v60 = vsel %vm819_vm0, %v919_v50, 0.0  ;;  %v871_v57 = vmul.f32 %v1578_v26, %v1977_v46 }
 0x118   :  { %v532_v38 = vpop.f32.mrf.mxu0  ;;  %v2033_v39 = vpop.f32.mrf.mxu1  ;;  %v891_v62 = vadd.f32 %v890_v58, %v889_v34  ;;  %v944_v63 = vadd.f32 %v943_v60, %v942_v37 }
 0x119   :  { %v869_v21 = vmul.f32 %v532_v38, %v1952_v28  ;;  %v922_v22 = vmul.f32 %v532_v38, %v532_v38  ;;  %v1252_v38 = vmul.f32 %v2017_v55, %v2017_v55 }
 0x11a   :  { %v1579_v51 = vpop.f32.mrf.mxu0  ;;  %v2037_v53 = vpop.f32.mrf.mxu1  ;;  %v893_v11 = vadd.f32 %v892_v42, %v891_v62  ;;  %v946_v13 = vadd.f32 %v945_v10, %v944_v63  ;;  %v854_v62 = vadd.f32 %v853_v33, %v852_v7  ;;  %v1199_v63 = vmul.f32 %v2017_v55, %v1862_v49 }
 0x11b   :  { %v896_v34 = vsel %vm819_vm0, %v869_v21, 0.0  ;;  %v949_v37 = vsel %vm819_vm0, %v922_v22, 0.0  ;;  %v1200_v42 = vmul.f32 %v679_v17, %v1857_v48  ;;  %v1201_v21 = vmul.f32 %v2013_v43, %v1871_v52 }
 0x11c   :  { %v535_v1 = vpop.f32.mrf.mxu0  ;;  %v2042_v5 = vpop.f32.mrf.mxu1  ;;  %v895_v25 = vadd.f32 %v894_v2, %v893_v11  ;;  %v948_v29 = vadd.f32 %v947_v18, %v946_v13  ;;  %v924_v11 = vmul.f32 %v1578_v26, %v1578_v26  ;;  %v872_v13 = vmul.f32 %v1579_v51, %v2002_v23 }
 0x11d   :  { %v870_v58 = vmul.f32 %v535_v1, %v1964_v36  ;;  %v923_v18 = vmul.f32 %v535_v1, %v535_v1  ;;  %v1254_v22 = vmul.f32 %v2013_v43, %v2013_v43  ;;  %v1268_v7 = vsel %vm819_vm0, %v1252_v38, 0.0 }
 0x11e   :  { %v2046_v14 = vpop.f32.mrf.mxu0  ;;  %v2048_v15 = vpop.f32.mrf.mxu1  ;;  %v897_v41 = vadd.f32 %v896_v34, %v895_v25  ;;  %v950_v44 = vadd.f32 %v949_v37, %v948_v29  ;;  %v1269_v17 = vsel %vm819_vm0, %v1253_v54, 0.0  ;;  %v900_v26 = vsel %vm819_vm0, %v871_v57, 0.0 }
 0x11f   :  { %v898_v2 = vsel %vm819_vm0, %v870_v58, 0.0  ;;  %v925_v29 = vmul.f32 %v1579_v51, %v1579_v51  ;;  %v951_v33 = vsel %vm819_vm0, %v923_v18, 0.0  ;;  %v1215_v1 = vsel %vm819_vm0, %v1199_v63, 0.0 }
 0x120   :  { %v2053_v9 = vpop.f32.mrf.mxu0  ;;  %v2055_v32 = vpop.f32.mrf.mxu1  ;;  %v899_v25 = vadd.f32 %v898_v2, %v897_v41  ;;  %v1216_v34 = vsel %vm819_vm0, %v1200_v42, 0.0  ;;  %v952_v58 = vadd.f32 %v951_v33, %v950_v44  ;;  %v953_v43 = vsel %vm819_vm0, %v924_v11, 0.0 }
 0x121   :  { %v902_v41 = vsel %vm819_vm0, %v872_v13, 0.0  ;;  %v855_v38 = vrot.slane %v854_v62, 1  ;;  %v1095_v54 = vmul.f32 %v1954_v31, %v1936_v20  ;;  %v1270_v57 = vadd.f32 %v1269_v17, %v1268_v7 }
 0x122   :  { %v2059_v47 = vpop.f32.mrf.mxu0  ;;  %v2061_v50 = vpop.f32.mrf.mxu1  ;;  %v901_v37 = vadd.f32 %v900_v26, %v899_v25  ;;  %v954_v2 = vadd.f32 %v953_v43, %v952_v58  ;;  %v1271_v63 = vsel %vm819_vm0, %v1254_v22, 0.0  ;;  %v1255_v44 = vmul.f32 %v2022_v3, %v2022_v3 }
 0x123   :  { %2612 = vst [vmem:[#allocation12_spill] sm:$0xff] %v2061_v50  ;;  %v1217_v42 = vadd.f32 %v1216_v34, %v1215_v1  ;;  %v955_v11 = vsel %vm819_vm0, %v925_v29, 0.0  ;;  %v1148_v13 = vmul.f32 %v1954_v31, %v1954_v31  ;;  %v1218_v25 = vsel %vm819_vm0, %v1201_v21, 0.0 }
 0x124   :  { %v2067_v60 = vpop.f32.mrf.mxu0  ;;  %v2072_v10 = vpop.f32.mrf.mxu1  ;;  %v2094_v51 = vadd.f32 %v902_v41, %v901_v37  ;;  %v1202_v7 = vmul.f32 %v2022_v3, %v1880_v56  ;;  %v2107_v17 = vadd.f32 %v955_v11, %v954_v2  ;;  %v1093_v22 = vmul.f32 %v1959_v35, %v1920_v12 }
 0x125   :  { %v1146_v33 = vmul.f32 %v1959_v35, %v1959_v35  ;;  %v1096_v29 = vmul.f32 %v1968_v40, %v1944_v24  ;;  %v1149_v31 = vmul.f32 %v1968_v40, %v1968_v40  ;;  %v1272_v21 = vadd.f32 %v1271_v63, %v1270_v57 }
 0x126   :  { %v2081_v55 = vpop.f32.mrf.mxu0  ;;  %v2088_v50 = vpop.f32.mrf.mxu1  ;;  %v2119_v1 = vadd.f32 %v855_v38, %v854_v62  ;;  %v2124_v34 = vsel %vm819_vm0, %v1095_v54, 0.0  ;;  %v1273_v37 = vsel %vm819_vm0, %v1255_v44, 0.0  ;;  %v1219_v58 = vadd.f32 %v1218_v25, %v1217_v42 }
 0x127   :  { %2615 = vst [vmem:[#allocation15_spill] sm:$0xff] %v2124_v34  ;;  %v1256_v35 = vmul.f32 %v2033_v39, %v2033_v39  ;;  %v2130_v43 = vsel %vm819_vm0, %v1148_v13, 0.0  ;;  %v1220_v41 = vsel %vm819_vm0, %v1202_v7, 0.0  ;;  %v1203_v40 = vmul.f32 %v2033_v39, %v1888_v61 }
 0x128   :  { %v2096_v18 = vpop.f32.mrf.mxu0  ;;  %v2109_v26 = vpop.f32.mrf.mxu1  ;;  %2614 = vst [vmem:[#allocation14_spill] sm:$0xff] %v2119_v1  ;;  %2616 = vst [vmem:[#allocation16_spill] sm:$0xff] %v2130_v43  ;;  %v1024_v62 = vmul.f32 %v2053_v9, %v2053_v9  ;;  %v2140_v54 = vsel %vm819_vm0, %v1093_v22, 0.0  ;;  %v2143_v57 = vsel %vm819_vm0, %v1146_v33, 0.0  ;;  %v1094_v2 = vmul.f32 %v1972_v45, %v1928_v16 }
 0x129   :  { %2613 = vst [vmem:[#allocation13_spill] sm:$0xff] %v2109_v26  ;;  %v1025_v63 = vmul.f32 %v2067_v60, %v2067_v60  ;;  %v2150_v44 = vsel %vm819_vm0, %v1096_v29, 0.0  ;;  %v2153_v39 = vsel %vm819_vm0, %v1149_v31, 0.0  ;;  %v1147_v42 = vmul.f32 %v1972_v45, %v1972_v45 }
 0x12a   :  { %v2121_v3 = vpop.f32.mrf.mxu0  ;;  %v2137_v38 = vpop.f32.mrf.mxu1  ;;  %2617 = vst [vmem:[#allocation17_spill] sm:$0xff] %v2150_v44  ;;  %2618 = vst [vmem:[#allocation18_spill] sm:$0xff] %v2153_v39  ;;  %v1274_v11 = vadd.f32 %v1273_v37, %v1272_v21  ;;  %v1221_v25 = vadd.f32 %v1220_v41, %v1219_v58  ;;  %v1275_v7 = vsel %vm819_vm0, %v1256_v35, 0.0  ;;  %v1257_v22 = vmul.f32 %v2042_v5, %v2042_v5 }
 0x12b   :  { %v1041_v33 = vsel %vm819_vm0, %v1025_v63, 0.0  ;;  %v1222_v29 = vsel %vm819_vm0, %v1203_v40, 0.0  ;;  %v1204_v31 = vmul.f32 %v2042_v5, %v1896_v0  ;;  %v1026_v39 = vmul.f32 %v2046_v14, %v2046_v14 }
 0x12c   :  { %v2157_v13 = vpop.f32.mrf.mxu0  ;;  %v1040_v45 = vsel %vm819_vm0, %v1024_v62, 0.0  ;;  %v2169_v21 = vpop.f32.mrf.mxu1  ;;  %v2172_v37 = vsel %vm819_vm0, %v1094_v2, 0.0  ;;  %v1099_v58 = vmul.f32 %v1984_v59, %v1977_v46  ;;  %v1152_v35 = vmul.f32 %v1984_v59, %v1984_v59 }
 0x12d   :  { %2619 = vst [vmem:[#allocation19_spill] sm:$0xff] %v2172_v37  ;;  %v1042_v41 = vadd.f32 %v1041_v33, %v1040_v45  ;;  %v2179_v40 = vsel %vm819_vm0, %v1147_v42, 0.0  ;;  %v1097_v5 = vmul.f32 %v1991_v6, %v1952_v28  ;;  %v1150_v62 = vmul.f32 %v1991_v6, %v1991_v6 }
 0x12e   :  { %2620 = vst [vmem:[#allocation20_spill] sm:$0xff] %v2179_v40  ;;  %v1276_v63 = vadd.f32 %v1275_v7, %v1274_v11  ;;  %v2185_v44 = vpop.f32.mrf.mxu0  ;;  %v1205_v2 = vmul.f32 %v2029_v27, %v1904_v4  ;;  %v1258_v46 = vmul.f32 %v2029_v27, %v2029_v27  ;;  %v1223_v59 = vadd.f32 %v1222_v29, %v1221_v25  ;;  %v2197_v11 = vpop.f32.mrf.mxu1 }
 0x12f   :  { %v1277_v33 = vsel %vm819_vm0, %v1257_v22, 0.0  ;;  %v904_v42 = vrot.slane %v2094_v51, 4  ;;  %v1224_v45 = vsel %vm819_vm0, %v1204_v31, 0.0  ;;  %v1043_v43 = vsel %vm819_vm0, %v1026_v39, 0.0 }
 0x130   :  { %v1027_v6 = vmul.f32 %v2059_v47, %v2059_v47  ;;  %v2200_v7 = vsel %vm819_vm0, %v1099_v58, 0.0  ;;  %v2203_v34 = vsel %vm819_vm0, %v1152_v35, 0.0  ;;  %v1100_v27 = vmul.f32 %v1997_v19, %v2002_v23  ;;  %v2214_v40 = vpop.f32.mrf.mxu0 }
 0x131   :  { %2621 = vst [vmem:[#allocation21_spill] sm:$0xff] %v2200_v7  ;;  %2622 = vst [vmem:[#allocation22_spill] sm:$0xff] %v2203_v34  ;;  %v1044_v25 = vadd.f32 %v1043_v43, %v1042_v41  ;;  %v2208_v22 = vsel %vm819_vm0, %v1097_v5, 0.0  ;;  %v2211_v39 = vsel %vm819_vm0, %v1150_v62, 0.0  ;;  %v957_v29 = vrot.slane %v2107_v17, 4 }
 0x132   :  { %2623 = vst [vmem:[#allocation23_spill] sm:$0xff] %v2208_v22  ;;  %2624 = vst [vmem:[#allocation24_spill] sm:$0xff] %v2211_v39  ;;  %v1278_v31 = vadd.f32 %v1277_v33, %v1276_v63  ;;  %v1098_v58 = vmul.f32 %v2008_v30, %v1964_v36  ;;  %v1279_v35 = vsel %vm819_vm0, %v1258_v46, 0.0  ;;  %v1259_v23 = vmul.f32 %v2037_v53, %v2037_v53  ;;  %v2226_v33 = vpop.f32.mrf.mxu1 }
 0x133   :  { %v1225_v43 = vadd.f32 %v1224_v45, %v1223_v59  ;;  %v1226_v41 = vsel %vm819_vm0, %v1205_v2, 0.0  ;;  %v905_v5 = vadd.f32 %v904_v42, %v2094_v51  ;;  %v1045_v62 = vsel %vm819_vm0, %v1027_v6, 0.0  ;;  %v2244_v6 = vpop.f32.mrf.mxu0 }
 0x134   :  { %v1028_v63 = vmul.f32 %v2096_v18, %v2096_v18  ;;  %v2229_v34 = vsel %vm819_vm0, %v1100_v27, 0.0  ;;  %v2233_v36 = vmul.f32 %v1997_v19, %v1997_v19  ;;  %v1206_v46 = vmul.f32 %v2037_v53, %v1912_v8 }
 0x135   :  { %2625 = vst [vmem:[#allocation25_spill] sm:$0xff] %v2229_v34  ;;  %v1046_v2 = vadd.f32 %v1045_v62, %v1044_v25  ;;  %v2239_v51 = vmul.f32 %v2008_v30, %v2008_v30  ;;  %v958_v59 = vadd.f32 %v957_v29, %v2107_v17  ;;  %v1280_v42 = vadd.f32 %v1279_v35, %v1278_v31  ;;  %v2257_v29 = vpop.f32.mrf.mxu1 }
 0x136   :  { %2626 = vst [vmem:[#allocation26_spill] sm:$0xff] %v2233_v36  ;;  %v972_v45 = vmul.f32 %v2067_v60, %v1857_v48  ;;  %v2247_v27 = vsel %vm819_vm0, %v1098_v58, 0.0  ;;  %v1281_v19 = vsel %vm819_vm0, %v1259_v23, 0.0  ;;  %v1227_v34 = vadd.f32 %v1226_v41, %v1225_v43 }
 0x137   :  { %2627 = vst [vmem:[#allocation27_spill] sm:$0xff] %v2247_v27  ;;  %v1260_v53 = vmul.f32 %v2055_v32, %v2055_v32  ;;  %v906_v25 = vrot.slane %v905_v5, 2  ;;  %v971_v30 = vmul.f32 %v2053_v9, %v1862_v49  ;;  %v1047_v17 = vsel %vm819_vm0, %v1028_v63, 0.0  ;;  %v2266_v63 = vpop.f32.mrf.mxu0 }
 0x138   :  { %v1029_v60 = vmul.f32 %v2157_v13, %v2157_v13  ;;  %v1228_v31 = vsel %vm819_vm0, %v1206_v46, 0.0  ;;  %v973_v58 = vmul.f32 %v2046_v14, %v1871_v52  ;;  %v1207_v35 = vmul.f32 %v2055_v32, %v1920_v12 }
 0x139   :  { %v1048_v23 = vadd.f32 %v1047_v17, %v1046_v2  ;;  %v959_v43 = vrot.slane %v958_v59, 2  ;;  %v1282_v41 = vadd.f32 %v1281_v19, %v1280_v42  ;;  %v988_v9 = vsel %vm819_vm0, %v972_v45, 0.0  ;;  %v743_v17 = vpop.f32.mrf.mxu1 }
 0x13a   :  { %v1049_v62 = vsel %vm819_vm0, %v1029_v60, 0.0  ;;  %v1209_v7 = vmul.f32 %v2048_v15, %v1936_v20  ;;  %v1262_v46 = vmul.f32 %v2048_v15, %v2048_v15  ;;  %v1283_v14 = vsel %vm819_vm0, %v1260_v53, 0.0 }
 0x13b   :  { %v1261_v32 = vmul.f32 %v2072_v10, %v2072_v10  ;;  %v907_v2 = vadd.f32 %v906_v25, %v905_v5  ;;  %v987_v42 = vsel %vm819_vm0, %v971_v30, 0.0  ;;  %v1229_v19 = vadd.f32 %v1228_v31, %v1227_v34  ;;  %v2284_v25 = vpop.f32.mrf.mxu0  ;;  %v2628_v30 = vld [vmem:[#allocation12_spill] sm:$0xff] }
 0x13c   :  { %v1030_v45 = vmul.f32 %v2081_v55, %v2081_v55  ;;  %v1230_v60 = vsel %vm819_vm0, %v1207_v35, 0.0  ;;  %v989_v36 = vadd.f32 %v988_v9, %v987_v42  ;;  %v1208_v27 = vmul.f32 %v2072_v10, %v1928_v16 }
 0x13d   :  { %v1050_v15 = vadd.f32 %v1049_v62, %v1048_v23  ;;  %v960_v39 = vadd.f32 %v959_v43, %v958_v59  ;;  %v990_v53 = vsel %vm819_vm0, %v973_v58, 0.0  ;;  %v1284_v22 = vadd.f32 %v1283_v14, %v1282_v41  ;;  %v2297_v43 = vpop.f32.mrf.mxu1 }
 0x13e   :  { %v974_v5 = vmul.f32 %v2059_v47, %v1880_v56  ;;  %v2287_v34 = vsel %vm819_vm0, %v1209_v7, 0.0  ;;  %v1210_v31 = vmul.f32 %v2628_v30, %v1944_v24  ;;  %v1263_v35 = vmul.f32 %v2628_v30, %v2628_v30 }
 0x13f   :  { %v1285_v10 = vsel %vm819_vm0, %v1261_v32, 0.0  ;;  %v908_v59 = vrot.slane %v907_v2, 1  ;;  %v1231_v23 = vadd.f32 %v1230_v60, %v1229_v19  ;;  %v1051_v58 = vsel %vm819_vm0, %v1030_v45, 0.0  ;;  %v2304_v60 = vpop.f32.mrf.mxu0 }
 0x140   :  { %v1031_v47 = vmul.f32 %v2121_v3, %v2121_v3  ;;  %v991_v41 = vadd.f32 %v990_v53, %v989_v36  ;;  %v1232_v7 = vsel %vm819_vm0, %v1208_v27, 0.0  ;;  %v977_v9 = vmul.f32 %v2081_v55, %v1904_v4  ;;  %v2319_v53 = vpop.f32.mrf.mxu1 }
 0x141   :  { %v1052_v62 = vadd.f32 %v1051_v58, %v1050_v15  ;;  %v961_v14 = vrot.slane %v960_v39, 1  ;;  %v1287_v42 = vsel %vm819_vm0, %v1262_v46, 0.0  ;;  %v992_v32 = vsel %vm819_vm0, %v974_v5, 0.0 }
 0x142   :  { %v1286_v19 = vadd.f32 %v1285_v10, %v1284_v22  ;;  %v2307_v45 = vsel %vm819_vm0, %v1210_v31, 0.0  ;;  %v1289_v30 = vsel %vm819_vm0, %v1263_v35, 0.0  ;;  %v975_v36 = vmul.f32 %v2096_v18, %v1888_v61 }
 0x143   :  { %2629 = vst [vmem:[#allocation12_spill] sm:$0xff] %v2307_v45  ;;  %v1366_v55 = vmul.f32 %v2226_v33, %v2226_v33  ;;  %v2314_v27 = vadd.f32 %v908_v59, %v907_v2  ;;  %v1233_v15 = vadd.f32 %v1232_v7, %v1231_v23  ;;  %v1053_v46 = vsel %vm819_vm0, %v1031_v47, 0.0  ;;  %v2330_v23 = vpop.f32.mrf.mxu0 }
 0x144   :  { %v1032_v22 = vmul.f32 %v2214_v40, %v2214_v40  ;;  %v2322_v5 = vsel %vm819_vm0, %v977_v9, 0.0  ;;  %v993_v31 = vadd.f32 %v992_v32, %v991_v41  ;;  %v1368_v18 = vmul.f32 %v2197_v11, %v2197_v11  ;;  %v2342_v32 = vpop.f32.mrf.mxu1 }
 0x145   :  { %v1054_v35 = vadd.f32 %v1053_v46, %v1052_v62  ;;  %v962_v10 = vadd.f32 %v961_v14, %v960_v39  ;;  %v1288_v58 = vadd.f32 %v1287_v42, %v1286_v19  ;;  %v1264_v2 = vmul.f32 %v2109_v26, %v2109_v26 }
 0x146   :  { %v1033_v59 = vmul.f32 %v2266_v63, %v2266_v63  ;;  %v994_v47 = vsel %vm819_vm0, %v975_v36, 0.0  ;;  %v976_v7 = vmul.f32 %v2157_v13, %v1896_v0  ;;  %v1382_v41 = vsel %vm819_vm0, %v1366_v55, 0.0 }
 0x147   :  { %v1367_v9 = vmul.f32 %v743_v17, %v743_v17  ;;  %v1055_v62 = vsel %vm819_vm0, %v1032_v22, 0.0  ;;  %v1313_v39 = vmul.f32 %v2226_v33, %v1862_v49  ;;  %v1369_v14 = vmul.f32 %v2257_v29, %v2257_v29  ;;  %v2348_v33 = vpop.f32.mrf.mxu0 }
 0x148   :  { %v1314_v42 = vmul.f32 %v743_v17, %v1857_v48  ;;  %v995_v19 = vadd.f32 %v994_v47, %v993_v31  ;;  %v1385_v36 = vsel %vm819_vm0, %v1368_v18, 0.0  ;;  %v1056_v46 = vadd.f32 %v1055_v62, %v1054_v35 }
 0x149   :  { %v1383_v13 = vsel %vm819_vm0, %v1367_v9, 0.0  ;;  %v1290_v55 = vadd.f32 %v1289_v30, %v1288_v58  ;;  %v1291_v45 = vsel %vm819_vm0, %v1264_v2, 0.0  ;;  %v1057_v22 = vsel %vm819_vm0, %v1033_v59, 0.0  ;;  %v759_v59 = vpop.f32.mrf.mxu1 }
 0x14a   :  { %v1384_v37 = vadd.f32 %v1383_v13, %v1382_v41  ;;  %v996_v26 = vsel %vm819_vm0, %v976_v7, 0.0  ;;  %v1265_v17 = vmul.f32 %v2169_v21, %v2169_v21  ;;  %v1034_v31 = vmul.f32 %v2185_v44, %v2185_v44 }
 0x14b   :  { %v1315_v18 = vmul.f32 %v2197_v11, %v1871_v52  ;;  %v1329_v30 = vsel %vm819_vm0, %v1313_v39, 0.0  ;;  %v1387_v35 = vsel %vm819_vm0, %v1369_v14, 0.0  ;;  %v1330_v58 = vsel %vm819_vm0, %v1314_v42, 0.0  ;;  %v2370_v42 = vpop.f32.mrf.mxu0 }
 0x14c   :  { %v1386_v2 = vadd.f32 %v1385_v36, %v1384_v37  ;;  %v963_v47 = vmul.f32 %v962_v10, %v2119_v1  ;;  %v2362_v7 = vadd.f32 %v2287_v34, %v1233_v15  ;;  %v1266_v41 = vmul.f32 %v2088_v50, %v2088_v50 }
 0x14d   :  { %v1058_v9 = vadd.f32 %v1057_v22, %v1056_v46  ;;  %v1292_v62 = vadd.f32 %v1291_v45, %v1290_v55  ;;  %v978_v11 = vmul.f32 %v2121_v3, %v1912_v8  ;;  %v997_v39 = vadd.f32 %v996_v26, %v995_v19  ;;  %v2380_v19 = vpop.f32.mrf.mxu1 }
 0x14e   :  { %v1370_v14 = vmul.f32 %v2319_v53, %v2319_v53  ;;  %v1293_v37 = vsel %vm819_vm0, %v1265_v17, 0.0  ;;  %v1059_v10 = vsel %vm819_vm0, %v1034_v31, 0.0  ;;  %v1331_v34 = vadd.f32 %v1330_v58, %v1329_v30  ;;  %v612_v30 = vpop.f32.mrf.mxu0 }
 0x14f   :  { %v1388_v15 = vadd.f32 %v1387_v35, %v1386_v2  ;;  %v1332_v36 = vsel %vm819_vm0, %v1315_v18, 0.0  ;;  %v1035_v45 = vmul.f32 %v2244_v6, %v2244_v6  ;;  %v1316_v3 = vmul.f32 %v2257_v29, %v1880_v56 }
 0x150   :  { %v1389_v26 = vsel %vm819_vm0, %v1370_v14, 0.0  ;;  %v964_v46 = vmax.f32 %v963_v47, 1e-16  ;;  %v1295_v13 = vsel %vm819_vm0, %v1266_v41, 0.0  ;;  %v1060_v55 = vadd.f32 %v1059_v10, %v1058_v9  ;;  %v2397_v10 = vpop.f32.mrf.mxu1 }
 0x151   :  { %v1372_v22 = vmul.f32 %v2297_v43, %v2297_v43  ;;  %v1000_v17 = vsel %vm819_vm0, %v978_v11, 0.0  ;;  %v1267_v31 = vmul.f32 %v2137_v38, %v2137_v38  ;;  %v981_v18 = vmul.f32 %v2185_v44, %v1936_v20 }
 0x152   :  { %v1390_v29 = vadd.f32 %v1389_v26, %v1388_v15  ;;  %v999_v35 = vadd.f32 %v2322_v5, %v997_v39  ;;  %v1294_v58 = vadd.f32 %v1293_v37, %v1292_v62  ;;  %v1333_v2 = vadd.f32 %v1332_v36, %v1331_v34  ;;  %v2413_v1 = vpop.f32.mrf.mxu1 }
 0x153   :  { %v1371_v47 = vmul.f32 %v759_v59, %v759_v59  ;;  %v1061_v41 = vsel %vm819_vm0, %v1035_v45, 0.0  ;;  %v1334_v9 = vsel %vm819_vm0, %v1316_v3, 0.0  ;;  %v1036_v11 = vmul.f32 %v2304_v60, %v2304_v60 }
 0x154   :  { %v1317_v14 = vmul.f32 %v2319_v53, %v1888_v61  ;;  %v1393_v44 = vsel %vm819_vm0, %v1372_v22, 0.0  ;;  %v1062_v15 = vadd.f32 %v1061_v41, %v1060_v55  ;;  %v1373_v5 = vmul.f32 %v2342_v32, %v2342_v32  ;;  %v1599_v53 = vpop.f32.mrf.mxu0 }
 0x155   :  { %v1391_v62 = vsel %vm819_vm0, %v1371_v47, 0.0  ;;  %v1297_v39 = vsel %vm819_vm0, %v1267_v31, 0.0  ;;  %v979_v37 = vmul.f32 %v2214_v40, %v1920_v12  ;;  %v1037_v34 = vmul.f32 %v2348_v33, %v2348_v33 }
 0x156   :  { %v1392_v36 = vadd.f32 %v1391_v62, %v1390_v29  ;;  %v1296_v45 = vadd.f32 %v1295_v13, %v1294_v58  ;;  %v1001_v3 = vadd.f32 %v1000_v17, %v999_v35  ;;  %v980_v26 = vmul.f32 %v2266_v63, %v1928_v16 }
 0x157   :  { %v1335_v55 = vadd.f32 %v1334_v9, %v1333_v2  ;;  %v1063_v22 = vsel %vm819_vm0, %v1036_v11, 0.0  ;;  %v1336_v47 = vsel %vm819_vm0, %v1317_v14, 0.0  ;;  %v1318_v31 = vmul.f32 %v759_v59, %v1896_v0  ;;  %v615_v59 = vpop.f32.mrf.mxu0 }
 0x158   :  { %v1394_v41 = vadd.f32 %v1393_v44, %v1392_v36  ;;  %1713 = vrsqrt.f32 %v964_v46  ;;  %v2416_v40 = vsel %vm819_vm0, %v981_v18, 0.0  ;;  %v1064_v29 = vadd.f32 %v1063_v22, %v1062_v15  ;;  %v2433_v15 = vpop.f32.mrf.mxu1 }
 0x159   :  { %v1395_v13 = vsel %vm819_vm0, %v1373_v5, 0.0  ;;  %v1002_v17 = vsel %vm819_vm0, %v979_v37, 0.0  ;;  %v1038_v63 = vmul.f32 %v2284_v25, %v2284_v25  ;;  %v1319_v35 = vmul.f32 %v2297_v43, %v1904_v4 }
 0x15a   :  { %v1065_v0 = vsel %vm819_vm0, %v1037_v34, 0.0  ;;  %v2425_v58 = vadd.f32 %v1297_v39, %v1296_v45  ;;  %v1003_v46 = vadd.f32 %v1002_v17, %v1001_v3  ;;  %v1337_v2 = vadd.f32 %v1336_v47, %v1335_v55  ;;  %v2443_v34 = vpop.f32.mrf.mxu0 }
 0x15b   :  { %v1374_v18 = vmul.f32 %v2397_v10, %v2397_v10  ;;  %v982_v9 = vmul.f32 %v2244_v6, %v1944_v24  ;;  %v1004_v11 = vsel %vm819_vm0, %v980_v26, 0.0  ;;  %v1338_v14 = vsel %vm819_vm0, %v1318_v31, 0.0 }
 0x15c   :  { %v1396_v44 = vadd.f32 %v1395_v13, %v1394_v41  ;;  %v1066_v4 = vadd.f32 %v1065_v0, %v1064_v29  ;;  %v1085_v43 = vmul.f32 %v612_v30, %v1862_v49  ;;  %v1138_v5 = vmul.f32 %v612_v30, %v612_v30  ;;  %v628_v13 = vpop.f32.mrf.mxu0 }
 0x15d   :  { %v1397_v62 = vsel %vm819_vm0, %v1374_v18, 0.0  ;;  %v1067_v39 = vsel %vm819_vm0, %v1038_v63, 0.0  ;;  %v1340_v37 = vsel %vm819_vm0, %v1319_v35, 0.0  ;;  %v1039_v24 = vmul.f32 %v2330_v23, %v2330_v23 }
 0x15e   :  { %v1320_v6 = vmul.f32 %v2342_v32, %v1912_v8  ;;  %v1339_v36 = vadd.f32 %v1338_v14, %v1337_v2  ;;  %v1087_v45 = vmul.f32 %v2370_v42, %v1871_v52  ;;  %v1140_v49 = vmul.f32 %v2370_v42, %v2370_v42  ;;  %v2454_v8 = vpop.f32.mrf.mxu1 }
 0x15f   :  { %v1086_v30 = vmul.f32 %v615_v59, %v1857_v48  ;;  %v1376_v3 = vmul.f32 %v2380_v19, %v2380_v19  ;;  %v1398_v26 = vadd.f32 %v1397_v62, %v1396_v44  ;;  %v1139_v55 = vmul.f32 %v615_v59, %v615_v59 }
 0x160   :  { %v1375_v22 = vmul.f32 %v2433_v15, %v2433_v15  ;;  %v1068_v32 = vadd.f32 %v1067_v39, %v1066_v4  ;;  %v1101_v47 = vsel %vm819_vm0, %v1085_v43, 0.0  ;;  %v1154_v52 = vsel %vm819_vm0, %v1138_v5, 0.0 }
 0x161   :  { %v1102_v31 = vsel %vm819_vm0, %v1086_v30, 0.0  ;;  %v1088_v42 = vmul.f32 %v1599_v53, %v1880_v56  ;;  %v1155_v41 = vsel %vm819_vm0, %v1139_v55, 0.0  ;;  %v1104_v17 = vsel %vm819_vm0, %v1087_v45, 0.0  ;;  %v2467_v56 = vpop.f32.mrf.mxu1  ;;  %v1603_v30 = vpop.f32.mrf.mxu0 }
 0x162   :  { %v1103_v48 = vadd.f32 %v1102_v31, %v1101_v47  ;;  %v1399_v29 = vsel %vm819_vm0, %v1375_v22, 0.0  ;;  %v1157_v63 = vsel %vm819_vm0, %v1140_v49, 0.0  ;;  %v1141_v35 = vmul.f32 %v1599_v53, %v1599_v53 }
 0x163   :  { %v1156_v0 = vadd.f32 %v1155_v41, %v1154_v52  ;;  %v1401_v59 = vsel %vm819_vm0, %v1376_v3, 0.0  ;;  %v1377_v2 = vmul.f32 %v2413_v1, %v2413_v1  ;;  %v1400_v14 = vadd.f32 %v1399_v29, %v1398_v26 }
 0x164   :  { %v1105_v18 = vadd.f32 %v1104_v17, %v1103_v48  ;;  %v1005_v44 = vadd.f32 %v1004_v11, %v1003_v46  ;;  %v1069_v4 = vsel %vm819_vm0, %v1039_v24, 0.0  ;;  %v1342_v43 = vsel %vm819_vm0, %v1320_v6, 0.0  ;;  %v1724_v17 = vld [vmem:[%s2602_s0 + $0x28] sm:$0xff] }
 0x165   :  { %v1158_v5 = vadd.f32 %v1157_v63, %v1156_v0  ;;  %v1714_v62 = vpop.eup %1713  ;;  %v1070_v39 = vadd.f32 %v1069_v4, %v1068_v32  ;;  %v1341_v45 = vadd.f32 %v1340_v37, %v1339_v36  ;;  %v1321_v53 = vmul.f32 %v2397_v10, %v1920_v12  ;;  %v2478_v32 = vpop.f32.mrf.mxu1 }
 0x166   :  { %v1106_v49 = vsel %vm819_vm0, %v1088_v42, 0.0  ;;  %v1159_v3 = vsel %vm819_vm0, %v1141_v35, 0.0  ;;  %v1402_v26 = vadd.f32 %v1401_v59, %v1400_v14  ;;  %v1089_v55 = vmul.f32 %v628_v13, %v1888_v61  ;;  %v631_v42 = vpop.f32.mrf.mxu0  ;;  %v1725_v59 = vld [vmem:[%s2602_s0 + $0x38] sm:$0xff] }
 0x167   :  { %v1142_v46 = vmul.f32 %v628_v13, %v628_v13  ;;  %v1299_v11 = vrot.slane %v2425_v58, 4  ;;  %v1403_v24 = vsel %vm819_vm0, %v1377_v2, 0.0  ;;  %v1107_v6 = vadd.f32 %v1106_v49, %v1105_v18  ;;  %v2498_v13 = vpop.f32.mrf.mxu1 }
 0x168   :  { %v1160_v22 = vadd.f32 %v1159_v3, %v1158_v5  ;;  %v1008_v37 = vsel %vm819_vm0, %v982_v9, 0.0  ;;  %v1007_v12 = vadd.f32 %v2416_v40, %v1005_v44  ;;  %v983_v10 = vmul.f32 %v2304_v60, %v1952_v28 }
 0x169   :  { %v1323_v36 = vmul.f32 %v2380_v19, %v1936_v20  ;;  %v1071_v61 = vrot.slane %v1070_v39, 4  ;;  %v1343_v47 = vadd.f32 %v1342_v43, %v1341_v45  ;;  %v1344_v52 = vsel %vm819_vm0, %v1321_v53, 0.0  ;;  %v1723_v20 = vld [vmem:[%s2602_s0 + $0x30] sm:$0xff] }
 0x16a   :  { %v1378_v31 = vmul.f32 %v2467_v56, %v2467_v56  ;;  %v1322_v48 = vmul.f32 %v2433_v15, %v1928_v16  ;;  %v1108_v9 = vsel %vm819_vm0, %v1089_v55, 0.0  ;;  %v1161_v40 = vsel %vm819_vm0, %v1142_v46, 0.0 }
 0x16b   :  { %v1404_v41 = vadd.f32 %v1403_v24, %v1402_v26  ;;  %v1091_v28 = vmul.f32 %v1723_v20, %v2443_v34  ;;  %v1109_v60 = vadd.f32 %v1108_v9, %v1107_v6  ;;  %v1162_v19 = vadd.f32 %v1161_v40, %v1160_v22 }
 0x16c   :  { %v1405_v29 = vsel %vm819_vm0, %v1378_v31, 0.0  ;;  %v1144_v16 = vmul.f32 %v2443_v34, %v2443_v34  ;;  %v1380_v15 = vmul.f32 %v2454_v8, %v2454_v8  ;;  %v1090_v63 = vmul.f32 %v1724_v17, %v631_v42  ;;  %v2631_v17 = vld [vmem:[#allocation19_spill] sm:$0xff] }
 0x16d   :  { %v1143_v35 = vmul.f32 %v631_v42, %v631_v42  ;;  %v1406_v0 = vadd.f32 %v1405_v29, %v1404_v41  ;;  %v1092_v2 = vmul.f32 %v1725_v59, %v1603_v30  ;;  %v1145_v18 = vmul.f32 %v1603_v30, %v1603_v30 }
 0x16e   :  { %v1381_v14 = vmul.f32 %v2478_v32, %v2478_v32  ;;  %v1110_v34 = vsel %vm819_vm0, %v1090_v63, 0.0  ;;  %v1379_v4 = vmul.f32 %v2498_v13, %v2498_v13  ;;  %v2517_v43 = vmul.f32 %v1714_v62, %v2314_v27  ;;  %v2632_v63 = vld [vmem:[#allocation20_spill] sm:$0xff] }
 0x16f   :  { %v1163_v44 = vsel %vm819_vm0, %v1143_v35, 0.0  ;;  %v1345_v5 = vadd.f32 %v1344_v52, %v1343_v47  ;;  %v1346_v45 = vsel %vm819_vm0, %v1322_v48, 0.0  ;;  %v1111_v53 = vadd.f32 %v1110_v34, %v1109_v60  ;;  %v2634_v34 = vld [vmem:[#allocation15_spill] sm:$0xff] }
 0x170   :  { %v1164_v49 = vadd.f32 %v1163_v44, %v1162_v19  ;;  %v1112_v30 = vsel %vm819_vm0, %v1091_v28, 0.0  ;;  %v1165_v3 = vsel %vm819_vm0, %v1144_v16, 0.0  ;;  %v1409_v26 = vsel %vm819_vm0, %v1380_v15, 0.0 }
 0x171   :  { %v1407_v55 = vsel %vm819_vm0, %v1379_v4, 0.0  ;;  %v1072_v46 = vadd.f32 %v1071_v61, %v1070_v39  ;;  %v1113_v24 = vadd.f32 %v1112_v30, %v1111_v53  ;;  %v1009_v31 = vadd.f32 %v1008_v37, %v1007_v12  ;;  %v1726_v39 = vld [vmem:[%s2602_s0 + $0x68] sm:$0xff]  ;;  %v1727_v12 = vld [vmem:[%s2602_s0 + $0x58] sm:$0xff] }
 0x172   :  { %v1166_v6 = vadd.f32 %v1165_v3, %v1164_v49  ;;  %v1408_v22 = vadd.f32 %v1407_v55, %v1406_v0  ;;  %v1114_v27 = vsel %vm819_vm0, %v1092_v2, 0.0  ;;  %v1167_v62 = vsel %vm819_vm0, %v1145_v18, 0.0  ;;  %v2633_v0 = vld [vmem:[#allocation12_spill] sm:$0xff]  ;;  %v2637_v55 = vld [vmem:[#allocation18_spill] sm:$0xff] }
 0x173   :  { %v1411_v47 = vsel %vm819_vm0, %v1381_v14, 0.0  ;;  %v1347_v52 = vadd.f32 %v1346_v45, %v1345_v5  ;;  %v1115_v42 = vadd.f32 %v1114_v27, %v1113_v24  ;;  %v1010_v40 = vsel %vm819_vm0, %v983_v10, 0.0 }
 0x174   :  { %v1168_v48 = vadd.f32 %v1167_v62, %v1166_v6  ;;  %v1410_v9 = vadd.f32 %v1409_v26, %v1408_v22  ;;  %v984_v61 = vmul.f32 %v1726_v39, %v2348_v33  ;;  %v1348_v37 = vsel %vm819_vm0, %v1323_v36, 0.0  ;;  %v1728_v33 = vld [vmem:[%s2602_s0 + $0x60] sm:$0xff]  ;;  %v2630_v36 = vld [vmem:[#allocation13_spill] sm:$0xff] }
 0x175   :  { %v1324_v41 = vmul.f32 %v1727_v12, %v2413_v1  ;;  %v1073_v20 = vrot.slane %v1072_v46, 2  ;;  %v1117_v28 = vadd.f32 %v2140_v54, %v1115_v42  ;;  %v1179_v19 = vsel %vm819_vm0, %v2239_v51, 0.0  ;;  %v2638_v62 = vld [vmem:[#allocation23_spill] sm:$0xff] }
 0x176   :  { %v1170_v60 = vadd.f32 %v2143_v57, %v1168_v48  ;;  %v1412_v10 = vadd.f32 %v1411_v47, %v1410_v9  ;;  %v1211_v29 = vmul.f32 %v1728_v33, %v2630_v36  ;;  %v1300_v16 = vadd.f32 %v1299_v11, %v2425_v58  ;;  %v2635_v58 = vld [vmem:[#allocation16_spill] sm:$0xff] }
 0x177   :  { %v1011_v1 = vadd.f32 %v1010_v40, %v1009_v31  ;;  %v1349_v15 = vadd.f32 %v1348_v37, %v1347_v52  ;;  %v1119_v54 = vadd.f32 %v2631_v17, %v1117_v28  ;;  %v1237_v51 = vadd.f32 %v2633_v0, %v2362_v7  ;;  %v1729_v7 = vld [vmem:[%s2602_s0 + $0x70] sm:$0xff]  ;;  %v2639_v52 = vld [vmem:[#allocation24_spill] sm:$0xff] }
 0x178   :  { %v1172_v57 = vadd.f32 %v2632_v63, %v1170_v60  ;;  %v1413_v35 = vrot.slane %v1412_v10, 4  ;;  %v1012_v59 = vsel %vm819_vm0, %v984_v61, 0.0  ;;  %v1350_v2 = vsel %vm819_vm0, %v1324_v41, 0.0  ;;  %v2641_v41 = vld [vmem:[#allocation26_spill] sm:$0xff] }
 0x179   :  { %v1325_v18 = vmul.f32 %v1728_v33, %v2467_v56  ;;  %v1074_v14 = vadd.f32 %v1073_v20, %v1072_v46  ;;  %v1121_v44 = vadd.f32 %v2634_v34, %v1119_v54  ;;  %v1238_v5 = vsel %vm819_vm0, %v1211_v29, 0.0  ;;  %v2636_v56 = vld [vmem:[#allocation17_spill] sm:$0xff] }
 0x17a   :  { %v1174_v11 = vadd.f32 %v2635_v58, %v1172_v57  ;;  %v1414_v4 = vadd.f32 %v1413_v35, %v1412_v10  ;;  %v1212_v45 = vmul.f32 %v1726_v39, %v2169_v21  ;;  %v1301_v53 = vrot.slane %v1300_v16, 2  ;;  %v2642_v29 = vld [vmem:[#allocation21_spill] sm:$0xff] }
 0x17b   :  { %v985_v49 = vmul.f32 %v1729_v7, %v2284_v25  ;;  %v1013_v30 = vadd.f32 %v1012_v59, %v1011_v1  ;;  %v1351_v3 = vadd.f32 %v1350_v2, %v1349_v15  ;;  %v1123_v26 = vadd.f32 %v2636_v56, %v1121_v44  ;;  %v2643_v1 = vld [vmem:[#allocation22_spill] sm:$0xff] }
 0x17c   :  { %v1176_v46 = vadd.f32 %v2637_v55, %v1174_v11  ;;  %v1213_v24 = vmul.f32 %v1729_v7, %v2088_v50  ;;  %v1352_v6 = vsel %vm819_vm0, %v1325_v18, 0.0  ;;  %v1326_v22 = vmul.f32 %v1726_v39, %v2498_v13  ;;  %v1730_v50 = vld [vmem:[%s2602_s0 + $0x78] sm:$0xff]  ;;  %s1496_s0 = sld [smem:[#allocation7 + $0x1]] }
 0x17d   :  { %v1415_v21 = vrot.slane %v1414_v4, 2  ;;  %v1239_v31 = vadd.f32 %v1238_v5, %v1237_v51  ;;  %v1075_v27 = vrot.slane %v1074_v14, 1  ;;  %v1125_v47 = vadd.f32 %v2638_v62, %v1123_v26  ;;  %v2640_v39 = vld [vmem:[#allocation27_spill] sm:$0xff] }
 0x17e   :  { %v1178_v42 = vadd.f32 %v2639_v52, %v1176_v46  ;;  %v1240_v25 = vsel %vm819_vm0, %v1212_v45, 0.0  ;;  %v1302_v48 = vadd.f32 %v1301_v53, %v1300_v16  ;;  %v1014_v9 = vsel %vm819_vm0, %v985_v49, 0.0 }
 0x17f   :  { %v986_v40 = vmul.f32 %v1730_v50, %v2330_v23  ;;  %v1015_v61 = vadd.f32 %v1014_v9, %v1013_v30  ;;  %v1353_v13 = vadd.f32 %v1352_v6, %v1351_v3  ;;  %v1127_v37 = vadd.f32 %v2640_v39, %v1125_v47 }
 0x180   :  { %v1180_v12 = vadd.f32 %v1179_v19, %v1178_v42  ;;  %v1183_v20 = vsel %vm819_vm0, %v2641_v41, 0.0  ;;  %v1327_v28 = vmul.f32 %v1729_v7, %v2454_v8  ;;  %v1354_v60 = vsel %vm819_vm0, %v1326_v22, 0.0  ;;  %v2644_v8 = vld [vmem:[#allocation25_spill] sm:$0xff] }
 0x181   :  { %v1416_v10 = vadd.f32 %v1415_v21, %v1414_v4  ;;  %v1241_v33 = vadd.f32 %v1240_v25, %v1239_v31  ;;  %v1076_v36 = vadd.f32 %v1075_v27, %v1074_v14  ;;  %v1129_v16 = vadd.f32 %v2642_v29, %v1127_v37  ;;  %v2645_v14 = vld [vmem:[#allocation14_spill] sm:$0xff] }
 0x182   :  { %v1182_v15 = vadd.f32 %v2643_v1, %v1180_v12  ;;  %v1242_v23 = vsel %vm819_vm0, %v1213_v24, 0.0  ;;  %v1214_v17 = vmul.f32 %v1730_v50, %v2137_v38  ;;  %v1303_v54 = vrot.slane %v1302_v48, 1 }
 0x183   :  { %v1016_v19 = vsel %vm819_vm0, %v986_v40, 0.0  ;;  %v1355_v35 = vadd.f32 %v1354_v60, %v1353_v13  ;;  %v1131_v0 = vadd.f32 %v2644_v8, %v1129_v16  ;;  %v1356_v51 = vsel %vm819_vm0, %v1327_v28, 0.0 }
 0x184   :  { %v1017_v63 = vadd.f32 %v1016_v19, %v1015_v61  ;;  %v1184_v57 = vadd.f32 %v1183_v20, %v1182_v15  ;;  %v1328_v59 = vmul.f32 %v1730_v50, %v2478_v32  ;;  %v1417_v2 = vrot.slane %v1416_v10, 1 }
 0x185   :  { %v1243_v18 = vadd.f32 %v1242_v23, %v1241_v33  ;;  %v1077_v34 = vmul.f32 %v1076_v36, %v2645_v14  ;;  %v1244_v58 = vsel %vm819_vm0, %v1214_v17, 0.0  ;;  %v1304_v38 = vadd.f32 %v1303_v54, %v1302_v48 }
 0x186   :  { %v1185_v44 = vrot.slane %v1184_v57, 4  ;;  %v1018_v11 = vrot.slane %v1017_v63, 4  ;;  %v1357_v5 = vadd.f32 %v1356_v51, %v1355_v35  ;;  %v1358_v45 = vsel %vm819_vm0, %v1328_v59, 0.0 }
 0x187   :  { %v1418_v53 = vadd.f32 %v1417_v2, %v1416_v10  ;;  %v1245_v7 = vadd.f32 %v1244_v58, %v1243_v18  ;;  %v1078_v49 = vmax.f32 %v1077_v34, 1e-16  ;;  %v1305_v3 = vmul.f32 %v1304_v38, %v2645_v14 }
 0x188   :  { %v1186_v4 = vadd.f32 %v1185_v44, %v1184_v57  ;;  %v1019_v32 = vadd.f32 %v1018_v11, %v1017_v63  ;;  %v1359_v26 = vadd.f32 %v1358_v45, %v1357_v5  ;;  %v1132_v6 = vrot.slane %v1131_v0, 4 }
 0x189   :  { %v1419_v55 = vmul.f32 %v1418_v53, %v2645_v14  ;;  %v1246_v46 = vrot.slane %v1245_v7, 4  ;;  %1715 = vrsqrt.f32 %v1078_v49  ;;  %v1306_v22 = vmax.f32 %v1305_v3, 1e-16 }
 0x18a   :  { %v1187_v30 = vrot.slane %v1186_v4, 2  ;;  %v1020_v21 = vrot.slane %v1019_v32, 2  ;;  %v1360_v31 = vrot.slane %v1359_v26, 4  ;;  %v1133_v52 = vadd.f32 %v1132_v6, %v1131_v0 }
 0x18b   :  { %v1420_v62 = vmax.f32 %v1419_v55, 1e-16  ;;  %v1247_v47 = vadd.f32 %v1246_v46, %v1245_v7  ;;  %1717 = vrsqrt.f32 %v1306_v22  ;;  %v1082_v33 = vstv %s1496_s0 }
 0x18c   :  { %v1188_v56 = vadd.f32 %v1187_v30, %v1186_v4  ;;  %v1021_v25 = vadd.f32 %v1020_v21, %v1019_v32  ;;  %v1361_v48 = vadd.f32 %v1360_v31, %v1359_v26  ;;  %v1134_v40 = vrot.slane %v1133_v52, 2 }
 0x18d   :  { %1719 = vrsqrt.f32 %v1420_v62  ;;  %v1248_v50 = vrot.slane %v1247_v47, 2  ;;  %v968_v16 = vstv %s967_s11  ;;  %v1196_v19 = vstv %s1497_s12 }
 0x18e   :  { %v1189_v24 = vrot.slane %v1188_v56, 1  ;;  %v1022_v61 = vrot.slane %v1021_v25, 1  ;;  %v1362_v13 = vrot.slane %v1361_v48, 2  ;;  %v1135_v37 = vadd.f32 %v1134_v40, %v1133_v52 }
 0x18f   :  { %v1249_v39 = vadd.f32 %v1248_v50, %v1247_v47  ;;  %v969_v63 = vmul.f32 %v968_v16, %v2517_v43  ;;  %v1310_v0 = vstv %s1498_s13  ;;  %v1424_v18 = vstv %s1499_s14 }
 0x190   :  { %v1190_v27 = vadd.f32 %v1189_v24, %v1188_v56  ;;  %v1023_v41 = vadd.f32 %v1022_v61, %v1021_v25  ;;  %v1363_v20 = vadd.f32 %v1362_v13, %v1361_v48  ;;  %v1136_v60 = vrot.slane %v1135_v37, 1 }
 0x191   :  { %v1250_v10 = vrot.slane %v1249_v39, 1  ;;  %v1428_v38 = vstv %s2606_s4 }
 0x192   :  { %v1191_v42 = vmul.f32 %v1190_v27, %v2645_v14  ;;  %v1364_v36 = vrot.slane %v1363_v20, 1  ;;  %v1137_v23 = vadd.f32 %v1136_v60, %v1135_v37 }
 0x193   :  { %v1251_v17 = vadd.f32 %v1250_v10, %v1249_v39 }
 0x194   :  { %v1192_v9 = vmax.f32 %v1191_v42, 1e-16  ;;  %v1365_v8 = vadd.f32 %v1364_v36, %v1363_v20 }
 0x196   :  { %1721 = vrsqrt.f32 %v1192_v9  ;;  %v1716_v12 = vpop.eup %1715 }
 0x197   :  { %v1080_v28 = vmul.f32 %v1716_v12, %v1023_v41 }
 0x198   :  { %v1718_v29 = vpop.eup %1717 }
 0x199   :  { %v1083_v15 = vmul.f32 %v1082_v33, %v1080_v28  ;;  %v1308_v35 = vmul.f32 %v1718_v29, %v1251_v17 }
 0x19a   :  { %v1720_v1 = vpop.eup %1719 }
 0x19b   :  { %v1084_v51 = vadd.f32 %v1083_v15, %v969_v63  ;;  %v1422_v2 = vmul.f32 %v1720_v1, %v1365_v8  ;;  %v1311_v34 = vmul.f32 %v1310_v0, %v1308_v35 }
 0x19d   :  { %v1425_v58 = vmul.f32 %v1424_v18, %v1422_v2 }
 0x1a3   :  { %v1722_v54 = vpop.eup %1721 }
 0x1a4   :  { %v1194_v57 = vmul.f32 %v1722_v54, %v1137_v23 }
 0x1a6   :  { %v1197_v59 = vmul.f32 %v1196_v19, %v1194_v57 }
 0x1a8   :  { %v1198_v14 = vadd.f32 %v1197_v59, %v1084_v51 }
 0x1aa   :  { %v1312_v44 = vadd.f32 %v1311_v34, %v1198_v14 }
 0x1ac   :  { %v1426_v11 = vadd.f32 %v1425_v58, %v1312_v44 }
 0x1ae   :  { %v1429_v43 = vadd.f32 %v1428_v38, %v1426_v11 }
 0x1b0   :  { %1431 = vst.msk [vmem:[#allocation8] sm:$0x1] %vm1430_vm1, %v1429_v43 }
 0x1b1   :  { %1774 = shalt.err (!%p1771_p0)
}
 0x1b2   :  { %1441 = dma.vmem_to_hbm [thread:$0]  %s1439_s18, 16, %s2607_s5, [#allocation5]  }
 0x1b3   :  { %1787 = dma.done.wait [#allocation5], 16  }
 0x1b4   :  { %1788 = vsyncadd [#allocation5], 4294967280 }
 0x1b5   :  { %1445 = vsyncpa [#allocation4], 1 }
 0x1b6   :  { %1446 = vsyncpa [#allocation5], 1 }
 0x1b7   :  { %1447 = vsyncpa [#allocation6], 1 }

</bundles_post_ra>
